<compile_context>
chip_gen: v7x
topology: tpu7x:2x2x1
jax: 0.10.0
libtpu: 0.0.40
codegen_flags: <defaults>
</compile_context>

<pallas_src>
import jax
import jax.numpy as jnp
from jax.experimental import pallas as pl
from jax.experimental.pallas import tpu as pltpu


def _svd_head_reduce_kernel(src_ref, corr_ref, w_ref, out_ref, lhs_ref, rhs_ref):
    # src_ref/corr_ref: (bblk, 3, nblk); w_ref: (bblk, 1, nblk)
    # out_ref: (bblk, 5, 7) resident accumulator across the point-chunk axis.
    k = pl.program_id(1)

    @pl.when(k == 0)
    def _():
        out_ref[...] = jnp.zeros_like(out_ref)

    src = src_ref[...]                     # (bblk, 3, nblk)
    corr = corr_ref[...]                   # (bblk, 3, nblk)
    w = w_ref[...]                         # (bblk, 1, nblk)
    ones = jnp.ones_like(w)

    # Stage the two operands of the single shared contraction in VMEM scratch
    # (cheap sublane-sliced stores) so the whole per-chunk reduction is ONE
    # MXU contraction instead of two.
    lhs_ref[:, 0:3, :] = src * w           # w-weighted src
    lhs_ref[:, 3:4, :] = w
    lhs_ref[:, 4:5, :] = ones
    rhs_ref[:, 0:3, :] = src
    rhs_ref[:, 3:6, :] = corr
    rhs_ref[:, 6:7, :] = ones

    # out[b, a, c] += sum_n lhs[b, a, n] * rhs[b, c, n]
    #   [0:3, 3:6] = H_raw      [0:3, 6] = sum w*src
    #   [3,   3:6] = sum w*corr [3,   6] = sum w
    #   [4,   0:3] = sum src    [4, 3:6] = sum corr
    out_ref[...] += jnp.einsum(
        'bin,bjn->bij', lhs_ref[...], rhs_ref[...],
        preferred_element_type=jnp.float32)


def _pick_blocks(batch, n):
    """Choose (bblk, nblk, npad) for the (batch, point-chunk) grid."""
    lane = 128
    n128 = -(-n // lane) * lane
    nblk_max = 2048                        # 16 lane-tiles per chunk: DMA sweet spot
    if n128 <= nblk_max:
        nblk = n128
    else:
        # Prefer a chunk size that divides the lane-aligned N exactly (no
        # padding pass); fall back to nblk_max if only tiny divisors exist.
        nblk = nblk_max
        for cand in range(nblk_max, lane - 1, -lane):
            if n128 % cand == 0:
                nblk = cand
                break
        if nblk < 1024:
            nblk = nblk_max
    npad = -(-n128 // nblk) * nblk

    # VMEM per grid step (f32): inputs (3+3+1 rows) double-buffered plus the
    # lhs/rhs staging scratch (5+7 rows) -> ~(2*7 + 12) * bblk * nblk * 4 B.
    budget = 10 * 1024 * 1024              # comfortable on every TPU generation
    bmax = max(1, budget // (104 * nblk))
    # Keep >=2 batch grid steps whenever possible so the "parallel" batch axis
    # can shard across v7x's two TensorCores.
    bcap = max(1, min(bmax, -(-batch // 2)))
    bblk = 1
    for d in range(min(batch, bcap), 0, -1):  # largest divisor of B -> no B pad
        if batch % d == 0:
            bblk = d
            break
    return bblk, nblk, npad


def svd_head_forward(src, src_corr, weights):
    """src, src_corr: (B, 3, N); weights: (B, N). Returns R (B,3,3), t (B,3)."""
    B, C, N = src.shape
    assert C == 3
    f32 = jnp.float32
    src = src.astype(f32)
    corr = src_corr.astype(f32)
    w = weights.astype(f32).reshape(B, 1, N)     # metadata-only reshape

    bblk, nblk, npad = _pick_blocks(B, N)
    if npad != N:
        # Rare path (N not lane/chunk aligned): zero padding is exact because
        # zero weights and zero coords contribute nothing to any sum.
        pad = ((0, 0), (0, 0), (0, npad - N))
        src = jnp.pad(src, pad)
        corr = jnp.pad(corr, pad)
        w = jnp.pad(w, pad)

    grid = (B // bblk, npad // nblk)

    sums = pl.pallas_call(
        _svd_head_reduce_kernel,
        out_shape=jax.ShapeDtypeStruct((B, 5, 7), f32),
        grid_spec=pltpu.PrefetchScalarGridSpec(
            num_scalar_prefetch=0,
            grid=grid,
            in_specs=[
                pl.BlockSpec((bblk, 3, nblk), lambda b, k: (b, 0, k)),
                pl.BlockSpec((bblk, 3, nblk), lambda b, k: (b, 0, k)),
                pl.BlockSpec((bblk, 1, nblk), lambda b, k: (b, 0, k)),
            ],
            out_specs=pl.BlockSpec((bblk, 5, 7), lambda b, k: (b, 0, 0)),
            scratch_shapes=[
                pltpu.VMEM((bblk, 5, nblk), f32),   # lhs staging
                pltpu.VMEM((bblk, 7, nblk), f32),   # rhs staging
            ],
        ),
        compiler_params=pltpu.CompilerParams(
            dimension_semantics=("parallel", "arbitrary"),
            vmem_limit_bytes=32 * 1024 * 1024),
    )(src, corr, w)

    h_raw = sums[:, 0:3, 3:6]      # (B,3,3)  sum_n w*src_i*corr_j
    wsrc = sums[:, 0:3, 6]         # (B,3)    sum_n w*src
    wcorr = sums[:, 3, 3:6]        # (B,3)    sum_n w*corr
    sum_w = sums[:, 3, 6]          # (B,)     sum_n w
    sum_src = sums[:, 4, 0:3]      # (B,3)    sum_n src
    sum_corr = sums[:, 4, 3:6]     # (B,3)    sum_n corr

    inv_n = f32(1.0 / N)           # true (unpadded) N, matches torch .mean(dim=2)
    src_mean = sum_src * inv_n
    corr_mean = sum_corr * inv_n

    # Mean-centering correction:
    #   H = sum_n w (s - sm)(c - cm)^T
    #     = H_raw - sm*(sum w c)^T - (sum w s)*cm^T + (sum w)*sm*cm^T
    H = (h_raw
         - src_mean[:, :, None] * wcorr[:, None, :]
         - wsrc[:, :, None] * corr_mean[:, None, :]
         + sum_w[:, None, None] * src_mean[:, :, None] * corr_mean[:, None, :])

    # TODO(synk): 3x3 SVD / determinant have no Pallas TPU primitive; done in
    # plain JAX on the tiny (B,3,3) outputs.
    u, _, vh = jnp.linalg.svd(H)
    v = jnp.swapaxes(vh, -1, -2)          # torch.svd's V convention
    ut = jnp.swapaxes(u, -1, -2)

    r = jnp.matmul(v, ut)
    det = jnp.linalg.det(r)
    reflect = jnp.diag(jnp.array([1.0, 1.0, -1.0], dtype=f32))
    v_fixed = jnp.where(det[:, None, None] < 0.0, jnp.matmul(v, reflect), v)
    R = jnp.matmul(v_fixed, ut)                           # (B, 3, 3)

    t = jnp.einsum('bij,bj->bi', -R, wsrc) + wcorr        # (B, 3)
    return R, t


def _reference(src, src_corr, weights):
    # Plain-JAX transcription of the PyTorch forward, for a correctness check.
    w = weights[:, None, :]
    sm = src.mean(axis=2, keepdims=True)
    cm = src_corr.mean(axis=2, keepdims=True)
    H = jnp.matmul((src - sm) * w, jnp.swapaxes(src_corr - cm, 1, 2))
    u, _, vh = jnp.linalg.svd(H)
    v = jnp.swapaxes(vh, -1, -2)
    ut = jnp.swapaxes(u, -1, -2)
    r = jnp.matmul(v, ut)
    det = jnp.linalg.det(r)
    reflect = jnp.diag(jnp.array([1.0, 1.0, -1.0], dtype=jnp.float32))
    v = jnp.where(det[:, None, None] < 0.0, jnp.matmul(v, reflect), v)
    R = jnp.matmul(v, ut)
    t = (jnp.matmul(-R, (w * src).sum(2, keepdims=True))
         + (w * src_corr).sum(2, keepdims=True))
    return R, t.reshape(src.shape[0], 3)


if __name__ == "__main__":
    key = jax.random.PRNGKey(0)
    k1, k2, k3 = jax.random.split(key, 3)
    B, N = 2, 256  # batch of 2 point clouds, 256 points each, 3D coords
    src = jax.random.normal(k1, (B, 3, N), dtype=jnp.float32)
    src_corr = src + 0.1 * jax.random.normal(k2, (B, 3, N), dtype=jnp.float32)
    weights = jax.nn.softmax(
        jax.random.normal(k3, (B, N), dtype=jnp.float32), axis=-1)

    R, t = jax.jit(svd_head_forward)(src, src_corr, weights)
    jax.block_until_ready((R, t))

    R_ref, t_ref = _reference(src, src_corr, weights)
    assert jnp.allclose(R, R_ref, atol=2e-3, rtol=2e-3), "R mismatch vs reference"
    assert jnp.allclose(t, t_ref, atol=2e-3, rtol=2e-3), "t mismatch vs reference"

    print("KERNEL_OK")
</pallas_src>

<mosaic_0001>
module attributes {stable_mosaic.version = 11 : i64} {
  func.func @_svd_head_reduce_kernel(%arg0: i32, %arg1: i32, %arg2: memref<1x3x256xf32, #tpu.memory_space<vmem>>, %arg3: memref<1x3x256xf32, #tpu.memory_space<vmem>>, %arg4: memref<1x1x256xf32, #tpu.memory_space<vmem>>, %arg5: memref<1x5x7xf32, #tpu.memory_space<vmem>>, %arg6: memref<1x5x256xf32, #tpu.memory_space<vmem>>, %arg7: memref<1x7x256xf32, #tpu.memory_space<vmem>>) attributes {dimension_semantics = [#tpu.dimension_semantics<parallel>, #tpu.dimension_semantics<arbitrary>], iteration_bounds = array<i64: 2, 1>, scalar_prefetch = 0 : i64, scratch_operands = 2 : i64, tpu.core_type = #tpu.core_type<tc>, window_params = [{transform_indices = @transform_0, window_bounds = array<i64: 1, 3, 256>}, {transform_indices = @transform_1, window_bounds = array<i64: 1, 3, 256>}, {transform_indices = @transform_2, window_bounds = array<i64: 1, 1, 256>}, {transform_indices = @transform_3, window_bounds = array<i64: 1, 5, 7>}]} {
    %c0_i32 = arith.constant 0 : i32
    %0 = arith.cmpi eq, %arg1, %c0_i32 : i32
    %1 = arith.extui %0 : i1 to i32
    %c0_i32_0 = arith.constant 0 : i32
    %2 = arith.cmpi ne, %1, %c0_i32_0 : i32
    scf.if %2 {
      %cst_37 = arith.constant 0.000000e+00 : f32
      %21 = vector.broadcast %cst_37 : f32 to vector<1x5x7xf32>
      %c0_38 = arith.constant 0 : index
      %c0_39 = arith.constant 0 : index
      %c0_40 = arith.constant 0 : index
      %22 = vector.load %arg5[%c0_38, %c0_39, %c0_40] : memref<1x5x7xf32, #tpu.memory_space<vmem>>, vector<1x5x7xf32>
      tpu.vector_store %arg5[%c0_38, %c0_39, %c0_40], %21 {strides = array<i32>} : memref<1x5x7xf32, #tpu.memory_space<vmem>>, vector<1x5x7xf32>,
    } else {
    }
    %c0 = arith.constant 0 : index
    %c0_1 = arith.constant 0 : index
    %c0_2 = arith.constant 0 : index
    %3 = vector.load %arg2[%c0, %c0_1, %c0_2] : memref<1x3x256xf32, #tpu.memory_space<vmem>>, vector<1x3x256xf32>
    %c0_3 = arith.constant 0 : index
    %c0_4 = arith.constant 0 : index
    %c0_5 = arith.constant 0 : index
    %4 = vector.load %arg3[%c0_3, %c0_4, %c0_5] : memref<1x3x256xf32, #tpu.memory_space<vmem>>, vector<1x3x256xf32>
    %c0_6 = arith.constant 0 : index
    %c0_7 = arith.constant 0 : index
    %c0_8 = arith.constant 0 : index
    %5 = vector.load %arg4[%c0_6, %c0_7, %c0_8] : memref<1x1x256xf32, #tpu.memory_space<vmem>>, vector<1x1x256xf32>
    %cst = arith.constant 1.000000e+00 : f32
    %6 = vector.broadcast %cst : f32 to vector<1x1x256xf32>
    %7 = vector.broadcast %5 : vector<1x1x256xf32> to vector<1x3x256xf32>
    %8 = arith.mulf %3, %7 : vector<1x3x256xf32>
    %c0_9 = arith.constant 0 : index
    %c0_10 = arith.constant 0 : index
    %c0_11 = arith.constant 0 : index
    %9 = vector.load %arg6[%c0_9, %c0_10, %c0_11] : memref<1x5x256xf32, #tpu.memory_space<vmem>>, vector<1x3x256xf32>
    tpu.vector_store %arg6[%c0_9, %c0_10, %c0_11], %8 {strides = array<i32>} : memref<1x5x256xf32, #tpu.memory_space<vmem>>, vector<1x3x256xf32>,
    %c0_12 = arith.constant 0 : index
    %c3 = arith.constant 3 : index
    %c0_13 = arith.constant 0 : index
    %10 = vector.load %arg6[%c0_12, %c3, %c0_13] : memref<1x5x256xf32, #tpu.memory_space<vmem>>, vector<1x1x256xf32>
    tpu.vector_store %arg6[%c0_12, %c3, %c0_13], %5 {strides = array<i32>} : memref<1x5x256xf32, #tpu.memory_space<vmem>>, vector<1x1x256xf32>,
    %c0_14 = arith.constant 0 : index
    %c4 = arith.constant 4 : index
    %c0_15 = arith.constant 0 : index
    %11 = vector.load %arg6[%c0_14, %c4, %c0_15] : memref<1x5x256xf32, #tpu.memory_space<vmem>>, vector<1x1x256xf32>
    tpu.vector_store %arg6[%c0_14, %c4, %c0_15], %6 {strides = array<i32>} : memref<1x5x256xf32, #tpu.memory_space<vmem>>, vector<1x1x256xf32>,
    %c0_16 = arith.constant 0 : index
    %c0_17 = arith.constant 0 : index
    %c0_18 = arith.constant 0 : index
    %12 = vector.load %arg7[%c0_16, %c0_17, %c0_18] : memref<1x7x256xf32, #tpu.memory_space<vmem>>, vector<1x3x256xf32>
    tpu.vector_store %arg7[%c0_16, %c0_17, %c0_18], %3 {strides = array<i32>} : memref<1x7x256xf32, #tpu.memory_space<vmem>>, vector<1x3x256xf32>,
    %c0_19 = arith.constant 0 : index
    %c3_20 = arith.constant 3 : index
    %c0_21 = arith.constant 0 : index
    %13 = vector.load %arg7[%c0_19, %c3_20, %c0_21] : memref<1x7x256xf32, #tpu.memory_space<vmem>>, vector<1x3x256xf32>
    tpu.vector_store %arg7[%c0_19, %c3_20, %c0_21], %4 {strides = array<i32>} : memref<1x7x256xf32, #tpu.memory_space<vmem>>, vector<1x3x256xf32>,
    %c0_22 = arith.constant 0 : index
    %c6 = arith.constant 6 : index
    %c0_23 = arith.constant 0 : index
    %14 = vector.load %arg7[%c0_22, %c6, %c0_23] : memref<1x7x256xf32, #tpu.memory_space<vmem>>, vector<1x1x256xf32>
    tpu.vector_store %arg7[%c0_22, %c6, %c0_23], %6 {strides = array<i32>} : memref<1x7x256xf32, #tpu.memory_space<vmem>>, vector<1x1x256xf32>,
    %c0_24 = arith.constant 0 : index
    %c0_25 = arith.constant 0 : index
    %c0_26 = arith.constant 0 : index
    %15 = vector.load %arg5[%c0_24, %c0_25, %c0_26] : memref<1x5x7xf32, #tpu.memory_space<vmem>>, vector<1x5x7xf32>
    %c0_27 = arith.constant 0 : index
    %c0_28 = arith.constant 0 : index
    %c0_29 = arith.constant 0 : index
    %16 = vector.load %arg6[%c0_27, %c0_28, %c0_29] : memref<1x5x256xf32, #tpu.memory_space<vmem>>, vector<1x5x256xf32>
    %c0_30 = arith.constant 0 : index
    %c0_31 = arith.constant 0 : index
    %c0_32 = arith.constant 0 : index
    %17 = vector.load %arg7[%c0_30, %c0_31, %c0_32] : memref<1x7x256xf32, #tpu.memory_space<vmem>>, vector<1x7x256xf32>
    "tpu.trace_start"() <{level = 10 : i32, message = "bin,bjn->bij"}> : () -> ()
    %cst_33 = arith.constant dense<0.000000e+00> : vector<1x5x7xf32>
    %18 = tpu.matmul %16, %17, %cst_33 {dimension_numbers = #tpu.dot_dimension_numbers<[2], [2], [1], [1], [0, 0, 0, 1, 1, 1], [0], [0]>} : vector<1x5x256xf32>, vector<1x7x256xf32>, vector<1x5x7xf32> -> vector<1x5x7xf32>
    "tpu.trace_stop"() : () -> ()
    %19 = arith.addf %15, %18 : vector<1x5x7xf32>
    %c0_34 = arith.constant 0 : index
    %c0_35 = arith.constant 0 : index
    %c0_36 = arith.constant 0 : index
    %20 = vector.load %arg5[%c0_34, %c0_35, %c0_36] : memref<1x5x7xf32, #tpu.memory_space<vmem>>, vector<1x5x7xf32>
    tpu.vector_store %arg5[%c0_34, %c0_35, %c0_36], %19 {strides = array<i32>} : memref<1x5x7xf32, #tpu.memory_space<vmem>>, vector<1x5x7xf32>,
    return
  }
  func.func @transform_0(%arg0: i32, %arg1: i32) -> (i32, i32, i32) {
    %c0_i32 = arith.constant 0 : i32
    %c0_i32_0 = arith.constant 0 : i32
    return %arg0, %c0_i32, %arg1 : i32, i32, i32
  }
  func.func @transform_1(%arg0: i32, %arg1: i32) -> (i32, i32, i32) {
    %c0_i32 = arith.constant 0 : i32
    %c0_i32_0 = arith.constant 0 : i32
    return %arg0, %c0_i32, %arg1 : i32, i32, i32
  }
  func.func @transform_2(%arg0: i32, %arg1: i32) -> (i32, i32, i32) {
    %c0_i32 = arith.constant 0 : i32
    %c0_i32_0 = arith.constant 0 : i32
    return %arg0, %c0_i32, %arg1 : i32, i32, i32
  }
  func.func @transform_3(%arg0: i32, %arg1: i32) -> (i32, i32, i32) {
    %c0_i32 = arith.constant 0 : i32
    %c0_i32_0 = arith.constant 0 : i32
    %c0_i32_1 = arith.constant 0 : i32
    return %arg0, %c0_i32, %c0_i32_0 : i32, i32, i32
  }
}

</mosaic_0001>

<bundles_post_ra>
// kernel: custom-call.57
= control target key start
LH: loop header
LB: loop body
LE: loop exit
PB: predicated region body
PF: predicated region fallthrough
CT: control target
= control target key end

     0   :  { %s645_s9 = smov 0   ;;  %s647_s10 = smov 0   ;;  %s795_s0 = inlined_call_operand.vmem [shape: f32[2,6,3], index: 0, kind: input, shape index: {}]   ;;  %s796_s1 = inlined_call_operand.vmem [shape: f32[2,6,3], index: 1, kind: output, shape index: {0}]   ;;  %s797_s2 = inlined_call_operand.vmem [shape: f32[2,3], index: 2, kind: output, shape index: {1}]  }
   0x1   :  { %s649_s11 = smov 0   ;;  %s651_s12 = smov 0  }
   0x2   :  { %s653_s13 = smov 0  }
   0x3 LB: > { %s28_s14 = sadd.s32 1, %s618_s12  ;;  %s500_s15 = sadd.s32 4294967295, %s622_s13   ;;  %s622_s13 = sphi %s653_s13, %s9_s13   ;;  %s618_s12 = sphi %s651_s12, %s804_s12   ;;  %s614_s11 = sphi %s649_s11, %s803_s11   ;;  %s610_s10 = sphi %s647_s10, %s802_s10   ;;  %s606_s9 = sphi %s645_s9, %s801_s9  }
   0x4   : > { %p30_p0 = scmp.ge.s32.totalorder %s28_s14, 2  ;;  %s33_s16 = ssub.s32 0, %s618_s12 }
   0x5   : > { %s502_s17 = smin.u32 %s618_s12, %s33_s16  ;;  %p57_p1 = scmp.ne.s32.totalorder %s610_s10, %s606_s9 }
   0x6   : > { %s806_s14 = smov (%p30_p0, %s28_s14), 0  ;;  %s35_s18 = sshrl.u32 %s502_s17, 3 }
   0x7   : > { %s39_s19 = ssub.s32 0, %s806_s14  ;;  %p58_p2 = scmp.eq.s32.totalorder %s500_s15, 1 }
   0x8   : > { %s503_s20 = smin.u32 %s39_s19, %s806_s14  ;;  %s47_s24 = sadd.s32 1, %s610_s10 }
   0x9   : > { %s41_s21 = sshrl.u32 %s503_s20, 3  ;;  %p680_p3 = por %p58_p2, %p57_p1 }
   0xa   : > { %s44_s23 = ssub.s32 %s35_s18, %s41_s21  ;;  %p505_p5 = scmp.ge.s32.totalorder %s622_s13, 2 }
   0xb   : > { %p45_p4 = scmp.eq.s32.totalorder %s44_s23, 0  ;;  %s82_s26 = sand.u32 (!%p505_p5), 1, %s622_s13  }
   0xc   : > { %80 = sbr.rel (%p505_p5) target bundleno = 19 (0x13), region = 16  ;;  %s507_s27 = sshll.u32 (!%p505_p5), %s618_s12, 3 }
   0xd   : > { %s686_s25 = scalar_select %p45_p4, %s610_s10, %s47_s24  }
   0xe   : > { %s506_s28 = sshll.u32 (!%p505_p5), %s82_s26, 3  ;;  %s88_s3 = scalar_lea.vmem (!%p505_p5), %s795_s0, %s507_s27 }
   0xf   : > { %v116_v0 = vld [vmem:[%s88_s3] sm:$0xff] (!%p505_p5)  ;;  %s84_s4 = scalar_lea.vmem (!%p505_p5), [#allocation0], %s506_s28 }
  0x10   : > { %117 = vst [vmem:[%s84_s4] sm:$0xff] (!%p505_p5), %v116_v0 }
  0x13 PF: > { %p508_p6 = scmp.ge.s32.totalorder %s622_s13, 1  ;;  %p122_p7 = scmp.lt.s32.totalorder %s622_s13, 3 }
  0x15   : > { %p123_p8 = pnand %p508_p6, %p122_p7 }
  0x17   : > { %126 = sbr.rel (%p123_p8) target bundleno = 330 (0x14a), region = 54 }
  0x1e   : > { %s129_s5 = sand.u32 1, %s500_s15   ;;  %s143_s6 = sand.u32 1, %s606_s9   ;;  %v628_v2 = vmov 0.0  }
  0x1f   : > { %s509_s7 = sshll.u32 %s129_s5, 3  ;;  %s697_s8 = sshll.u32 %s143_s6, 1 }
  0x20   : > { %s152_s16 = sand.u32 7, %s614_s11   ;;  %s131_s17 = scalar_lea.vmem [#allocation0], %s509_s7 }
  0x21   : > { %v154_v1 = vld [vmem:[%s131_s17] sm:$0xff]  ;;  %s700_s18 = scalar_lea.vmem [#allocation1], %s509_s7  ;;  %s703_s19 = scalar_lea.vmem [#allocation2], %s152_s16 }
  0x22   : > { %155 = vst [vmem:[%s700_s18] sm:$0xff] %v154_v1  ;;  %156 = vst [vmem:[%s703_s19] sm:$0x1] %v628_v2  ;;  %s145_s15 = scalar_lea.vmem [#allocation3], %s697_s8  ;;  %s707_s20 = smov 0  }
  0x23 LB: >> { %v164_v3 = vlaneseq  ;;  %v716_v5 = vstv %s626_s20  ;;  %s191_s9 = scalar_lea.vmem %s700_s18, %s626_s20 [#allocation1]  ;;  %s249_s21 = scalar_lea.vmem [#allocation4], %s626_s20  ;;  %v629_v59 = vmov 1.0   ;;  %s626_s20 = sphi %s707_s20, %s162_s20  }
  0x24   : >> { %s266_s23 = smov [#allocation4] }
  0x25   : >> { %v713_v4 = vshrl.u32 %v164_v3, 7  ;;  %v243_v48 = vand.u32 127, %v164_v3 }
  0x27   : >> { %vm168_vm0 = vcmp.gt.s32.totalorder %v713_v4, %v716_v5  ;;  %vm169_vm1 = vcmp.lt.s32.totalorder %v713_v4, 6  ;;  %v230_v4 = vmov %v713_v4  ;;  %vm734_vm12 = vcmp.eq.s32.totalorder %v243_v48, %v716_v5 }
  0x28   : >> { %vm170_vm2 = vmand %vm168_vm0, %vm169_vm1  ;;  %vm234_vm9 = vcmp.gt.s32.totalorder %v230_v4, %v716_v5  ;;  %vm235_vm10 = vcmp.lt.s32.totalorder %v230_v4, 6  ;;  %v269_v4 = vmov %v713_v4  ;;  %vm295_vm15 = vcmp.gt.s32.totalorder %v243_v48, %v716_v5 }
  0x29   : >> { %v163_v6 = vld [vmem:[%s700_s18] sm:$0xff]  ;;  %v192_v15 = vld [vmem:[%s191_s9] ss:$0 sm:$0xff]  ;;  %s227_s18 = smov %s700_s18  ;;  %vm236_vm11 = vmand %vm234_vm9, %vm235_vm10  ;;  %vm274_vm13 = vcmp.lt.s32.totalorder %v269_v4, 6  ;;  %v286_v4 = vmov %v713_v4 }
  0x2a   : >> { %v171_v7 = vsel %vm170_vm2, %v163_v6, 0.0  ;;  %v193_v16 = vand.u32 2147483647, %v192_v15  ;;  %vm218_vm8 = vcmp.lt.f32.partialorder %v192_v15, 0.0  ;;  %v231_v45 = vld [vmem:[%s227_s18] sm:$0xff]  ;;  %s265_s18 = smov %s700_s18  ;;  %vm303_vm14 = vcmp.ge.s32.totalorder %v286_v4, %v716_v5 }
  0x2b   : >> { %v172_v8 = vmul.f32 %v171_v7, %v171_v7  ;;  %v237_v49 = vsel %vm236_vm11, %v231_v45, 0.0  ;;  %v262_v60 = vld [vmem:[%s703_s19] ss:$0 sm:$0xff]  ;;  %vm304_vm0 = vmand %vm734_vm12, %vm303_vm14 }
  0x2c   : >> { %v194_v21 = vmax.f32 %v193_v16, 0.0  ;;  %v272_v63 = vld [vmem:[%s265_s18] sm:$0xff]  ;;  %s282_s18 = smov %s265_s18 }
  0x2d   : >> { %v173_v9 = vrot.slane %v172_v8, 4  ;;  %s307_s24 = scalar_lea.vmem %s282_s18, %s626_s20  ;;  %s162_s20 = sadd.s32 1, %s626_s20  }
  0x2e   : >> { %p159_p9 = scmp.ge.s32.totalorder %s162_s20, 3  }
  0x2f   : >> { %v174_v10 = vadd.f32 %v173_v9, %v172_v8  ;;  %s515_s26 = sshll.u32 (%p159_p9), %s614_s11, 3 }
  0x30   : > { %s332_s29 = scalar_lea.vmem (%p159_p9), %s796_s1, %s515_s26 }
  0x31   : >> { %v175_v11 = vrot.slane %v174_v10, 2 }
  0x33   : >> { %v176_v12 = vadd.f32 %v175_v11, %v174_v10 }
  0x35   : >> { %v177_v13 = vrot.slane %v176_v12, 1 }
  0x37   : >> { %v178_v14 = vadd.f32 %v177_v13, %v176_v12  ;;  %v293_v13 = vld [vmem:[%s282_s18] sm:$0xff] }
  0x39   : >> { %570 = vrsqrt.f32 %v178_v14  ;;  %vm181_vm3 = vcmp.eq.f32.partialorder %v178_v14, inf  ;;  %v184_v18 = vand.u32 2147483648, %v178_v14  ;;  %vm183_vm4 = vcmp.eq.f32.partialorder %v178_v14, 0.0 }
  0x43   : >> { %v571_v17 = vpop.eup %570 }
  0x44   : >> { %v180_v19 = vmul.f32 %v571_v17, %v178_v14 }
  0x46   : >> { %v182_v20 = vsel %vm181_vm3, %v178_v14, %v180_v19 }
  0x47   : >> { %v185_v22 = vsel %vm183_vm4, %v184_v18, %v182_v20 }
  0x48   : >> { %v195_v23 = vand.u32 2147483647, %v185_v22 }
  0x4a   : >> { %v196_v24 = vmax.f32 %v194_v21, %v195_v23 }
  0x4c   : >> { %572 = vrcp.f32 %v196_v24  ;;  %vm208_vm7 = vcmp.eq.f32.partialorder %v196_v24, 0.0 }
  0x56   : >> { %v573_v25 = vpop.eup %572 }
  0x57   : >> { %v198_v26 = vmul.f32 %v573_v25, %v193_v16  ;;  %v201_v27 = vmul.f32 0.0, %v573_v25  ;;  %v205_v28 = vmul.f32 %v573_v25, %v195_v23 }
  0x59   : >> { %v199_v29 = vmul.f32 %v198_v26, %v198_v26  ;;  %v202_v30 = vmul.f32 %v201_v27, %v201_v27  ;;  %v206_v31 = vmul.f32 %v205_v28, %v205_v28 }
  0x5b   : >> { %v203_v32 = vadd.f32 %v202_v30, %v199_v29 }
  0x5d   : >> { %v207_v33 = vadd.f32 %v206_v31, %v203_v32 }
  0x5f   : >> { %574 = vrsqrt.f32 %v207_v33  ;;  %vm211_vm5 = vcmp.eq.f32.partialorder %v207_v33, inf  ;;  %v214_v35 = vand.u32 2147483648, %v207_v33  ;;  %vm213_vm6 = vcmp.eq.f32.partialorder %v207_v33, 0.0 }
  0x69   : >> { %v575_v34 = vpop.eup %574 }
  0x6a   : >> { %v210_v36 = vmul.f32 %v575_v34, %v207_v33 }
  0x6c   : >> { %v212_v37 = vsel %vm211_vm5, %v207_v33, %v210_v36 }
  0x6d   : >> { %v215_v38 = vsel %vm213_vm6, %v214_v35, %v212_v37 }
  0x6e   : >> { %v216_v39 = vmul.f32 %v215_v38, %v196_v24 }
  0x70   : >> { %v217_v40 = vsel %vm208_vm7, 0.0, %v216_v39 }
  0x71   : >> { %v219_v41 = vxor.u32 2147483648, %v217_v40 }
  0x73   : >> { %v220_v42 = vsel %vm218_vm8, %v217_v40, %v219_v41 }
  0x74   : >> { %v726_v43 = vsel %vm183_vm4, %v192_v15, %v220_v42  ;;  %576 = vrcp.f32 %v220_v42  ;;  %v221_v46 = vsub.f32 %v220_v42, %v192_v15 }
  0x75   : >> { %v226_v44 = vsub.f32 %v192_v15, %v726_v43 }
  0x77   : >> { %578 = vrcp.f32 %v226_v44 }
  0x7e   : >> { %v577_v47 = vpop.eup %576 }
  0x7f   : >> { %v223_v50 = vmul.f32 %v577_v47, %v221_v46 }
  0x81   : >> { %v579_v51 = vpop.eup %578  ;;  %v225_v55 = vsel %vm183_vm4, 0.0, %v223_v50 }
  0x82   : >> { %v239_v52 = vmul.f32 %v579_v51, %v237_v49  ;;  %v255_v57 = vsel %vm734_vm12, %v225_v55, 0.0 }
  0x84   : >> { %v240_v54 = vsel %vm183_vm4, 0.0, %v239_v52 }
  0x85   : >> { %v245_v56 = vsel %vm734_vm12, %v240_v54, 0.0 }
  0x86   : >> { %246 = vadd.xlane.f32.xlu0 %v245_v56 }
  0x8a   : >> { %256 = vadd.xlane.f32.xlu0 %v255_v57 }
 0x113   : >> { %v247_v58 = vpop.xlane.xlu0 %246 }
 0x114   : >> { %248 = vst [vmem:[#allocation4] sm:$0xff] %v247_v58 }
 0x115   : >> { %250 = vst [vmem:[%s249_s21] sm:$0x1] %v629_v59 }
 0x117   : >> { %v257_v61 = vpop.xlane.xlu0 %256 }
 0x118   : >> { %v263_v62 = vsel %vm734_vm12, %v257_v61, %v262_v60 }
 0x119   : >> { %264 = vst [vmem:[%s703_s19] sm:$0x1] %v263_v62 }
 0x11c   : >> { %v271_v0 = vld [vmem:[%s266_s23] sm:$0xff]  ;;  %s283_s23 = smov %s266_s23 }
 0x11d   : >> { %v273_v1 = vmul.f32 %v272_v63, %v271_v0  ;;  %v291_v12 = vld [vmem:[%s283_s23] sm:$0xff] }
 0x11f   : >> { %v275_v2 = vsel %vm274_vm13, %v273_v1, 0.0 }
 0x120   : >> { %v276_v3 = vrot.slane %v275_v2, 4  ;;  %v318_v4 = vld [vmem:[#allocation2] sm:$0x3] (%p159_p9) }
 0x121   : > { %320 = vst [vmem:[%s145_s15] sm:$0x3] (%p159_p9), %v318_v4 }
 0x122   : >> { %v277_v6 = vadd.f32 %v276_v3, %v275_v2 }
 0x124   : >> { %v278_v7 = vrot.slane %v277_v6, 2 }
 0x126   : >> { %v279_v8 = vadd.f32 %v278_v7, %v277_v6 }
 0x128   : >> { %v280_v9 = vrot.slane %v279_v8, 1 }
 0x12a   : >> { %v281_v10 = vadd.f32 %v280_v9, %v279_v8 }
 0x12c   : >> { %v287_v11 = vmul.f32 %v281_v10, %v257_v61 }
 0x12e   : >> { %v292_v14 = vmul.f32 %v291_v12, %v287_v11 }
 0x130   : >> { %v296_v15 = vsub.f32 %v293_v13, %v292_v14 }
 0x132   : >> { %v297_v16 = vsel %vm295_vm15, %v296_v15, %v293_v13 }
 0x133   : >> { %v305_v17 = vsel %vm304_vm0, %v291_v12, %v297_v16 }
 0x134   : >> { %306 = vst [vmem:[%s282_s18] sm:$0xff] %v305_v17 }
 0x137   : > { %161 = sbr.rel (!%p159_p9) target bundleno = 35 (0x23), region = 175 }
 0x13b   : >> { %v308_v18 = vld [vmem:[%s307_s24] ss:$0 sm:$0xff] }
 0x13c   : >> { %v313_v19 = vsel %vm734_vm12, %v726_v43, %v308_v18 }
 0x13d   : >> { %314 = vst [vmem:[%s307_s24] sm:$0x1] %v313_v19 }
 0x13e   : > { %p368_p10 = scmp.lt.s32.totalorder (%p680_p3), %s614_s11, 0  ;;  %s369_s30 = ssub.s32 (%p680_p3), 0, %s614_s11  ;;  %v391_v20 = vld [vmem:[%s145_s15] sm:$0x3] (%p680_p3) }
 0x13f   : > { %367 = sbr.rel (!%p680_p3) target bundleno = 330 (0x14a), region = 99  ;;  %s516_s3 = smin.u32 (%p680_p3), %s614_s11, %s369_s30 }
 0x140   : > { %s371_s4 = sshrl.u32 (%p680_p3), %s516_s3, 3 }
 0x141   : > { %s372_s5 = ssub.s32 (%p680_p3), 0, %s371_s4 }
 0x144   : > { %v360_v5 = vld [vmem:[%s700_s18] sm:$0xff] }
 0x145   : > { %361 = vst [vmem:[%s332_s29] sm:$0xff] %v360_v5 }
 0x146   : > { %s808_s5 = smov (!%p368_p10, %s372_s5), %s371_s4 }
 0x147   : > { %s517_s6 = sshll.u32 %s808_s5, 1 }
 0x148   : > { %s375_s17 = scalar_lea.vmem %s797_s2, %s517_s6 }
 0x149   : > { %392 = vst [vmem:[%s375_s17] sm:$0x3] %v391_v20 }
 0x14a PF: > { %s9_s13 = sadd.s32 1, %s622_s13   ;;  %s801_s9 = smov %s610_s10 }
 0x14b   : > { %p6_p11 = scmp.ge.s32.totalorder %s9_s13, 4   ;;  %s802_s10 = smov %s686_s25 }
 0x14c   : > { %s803_s11 = smov %s618_s12  ;;  %s804_s12 = smov %s806_s14 }
 0x14d   :  { %8 = sbr.rel (!%p6_p11) target bundleno = 3 (0x3), region = 186 }

// kernel: custom-call.58
= control target key start
LH: loop header
LB: loop body
LE: loop exit
PB: predicated region body
PF: predicated region fallthrough
CT: control target
= control target key end

     0   :  { %s236_s6 = smov 0   ;;  %s263_s0 = inlined_call_operand.vmem [shape: f32[2,3,3], index: 0, kind: input, shape index: {}]   ;;  %s264_s1 = inlined_call_operand.vmem [shape: f32[2,3,3], index: 1, kind: output, shape index: {}]  }
   0x1 LB: > { %s198_s7 = sadd.s32 4294967295, %s224_s6   ;;  %p200_p0 = scmp.ge.s32.totalorder %s224_s6, 2  ;;  %s224_s6 = sphi %s236_s6, %s7_s6  }
   0x2   : > { %s23_s8 = sand.u32 (!%p200_p0), 1, %s224_s6   ;;  %s202_s9 = sshll.u32 (!%p200_p0), %s224_s6, 2 }
   0x3   : > { %21 = sbr.rel (%p200_p0) target bundleno = 10 (0xa), region = 16  ;;  %s201_s10 = sshll.u32 (!%p200_p0), %s23_s8, 2 }
   0x4   : > { %s27_s13 = scalar_lea.vmem (!%p200_p0), %s263_s0, %s202_s9  ;;  %s25_s14 = scalar_lea.vmem (!%p200_p0), [#allocation1], %s201_s10 }
   0x5   : > { %v43_v0 = vld [vmem:[%s27_s13] sm:$0xf] (!%p200_p0) }
   0x6   : > { %44 = vst [vmem:[%s25_s14] sm:$0xf] (!%p200_p0), %v43_v0 }
   0xa PF: > { %p203_p1 = scmp.ge.s32.totalorder %s224_s6, 1  ;;  %p60_p2 = scmp.lt.s32.totalorder %s224_s6, 3 }
   0xc   : > { %p61_p3 = pnand %p203_p1, %p60_p2 }
   0xd   : > { %s252_s15 = sand.u32 (!%p61_p3), 1, %s198_s7   ;;  %v82_v1 = vlaneseq (!%p61_p3)  ;;  %vm96_vm1 = vcmask (!%p61_p3), 23552   ;;  %s207_s19 = sshll.u32 (!%p61_p3), %s198_s7, 2 }
   0xe   : > { %64 = sbr.rel (%p61_p3) target bundleno = 334 (0x14e), region = 50  ;;  %s204_s16 = sshll.u32 (!%p61_p3), %s252_s15, 2 }
   0xf   : > { %s73_s17 = scalar_lea.vmem (!%p61_p3), [#allocation1], %s204_s16  ;;  %v83_v3 = vand.u32 (!%p61_p3), 127, %v82_v1  ;;  %v85_v4 = vshrl.u32 (!%p61_p3), %v82_v1, 7  ;;  %s77_s18 = scalar_lea.vmem (!%p61_p3), [#allocation3], %s204_s16 }
  0x10   : > { %v80_v2 = vld [vmem:[%s73_s17] sm:$0xf] (!%p61_p3)  ;;  %s128_s22 = scalar_lea.vmem (!%p61_p3), %s264_s1, %s207_s19 }
  0x11   : > { %81 = vst [vmem:[#allocation0] sm:$0xf] (!%p61_p3), %v80_v2  ;;  %vm91_vm0 = vcmp.eq.s32.totalorder (!%p61_p3), %v83_v3, 0  ;;  %vm87_vm2 = vcmp.eq.s32.totalorder (!%p61_p3), %v83_v3, %v85_v4  ;;  %vm100_vm3 = vcmp.eq.s32.totalorder (!%p61_p3), %v83_v3, 1  ;;  %vm111_vm4 = vcmp.eq.s32.totalorder (!%p61_p3), %v83_v3, 2 }
  0x18   : > { %v88_v5 = vld [vmem:[#allocation0] sm:$0xff] }
  0x19   : > { %v95_v6 = vld [vmem:[#allocation0 + $0x1] ss:$0 sm:$0xff]  ;;  %v92_v7 = vsel %vm91_vm0, %v88_v5, 1.0  ;;  %v106_v11 = vld [vmem:[#allocation0 + $0x2] ss:$0 sm:$0xff] }
  0x1a   : > { %v97_v8 = vsel %vm96_vm1, %v95_v6, 0.0  ;;  %v93_v9 = vsel %vm87_vm2, %v92_v7, 0.0  ;;  %v108_v12 = vsel %vm96_vm1, %v106_v11, 0.0 }
  0x1b   : > { %v101_v10 = vmul.f32 %v97_v8, %v93_v9 }
  0x1d   : > { %102 = vadd.xlane.f32.xlu0 %v101_v10 }
  0xaa   : > { %v103_v13 = vpop.xlane.xlu0 %102 }
  0xab   : > { %v104_v14 = vsel %vm100_vm3, %v103_v13, %v93_v9 }
  0xac   : > { %v112_v15 = vmul.f32 %v108_v12, %v104_v14 }
  0xae   : > { %113 = vadd.xlane.f32.xlu0 %v112_v15 }
 0x13b   : > { %v114_v16 = vpop.xlane.xlu0 %113 }
 0x13c   : > { %v115_v17 = vsel %vm111_vm4, %v114_v16, %v104_v14 }
 0x13d   : > { %116 = vst [vmem:[#allocation2] sm:$0xff] %v115_v17 }
 0x144   : > { %v120_v18 = vld [vmem:[#allocation2] sm:$0xf] }
 0x145   : > { %122 = vst [vmem:[%s77_s18] sm:$0xf] %v120_v18 }
 0x14c   : > { %v144_v19 = vld [vmem:[%s77_s18] sm:$0xf] }
 0x14d   : > { %145 = vst [vmem:[%s128_s22] sm:$0xf] %v144_v19 }
 0x14e PF: > { %s7_s6 = sadd.s32 1, %s224_s6  }
 0x14f   : > { %p4_p4 = scmp.ge.s32.totalorder %s7_s6, 4  }
 0x151   :  { %6 = sbr.rel (!%p4_p4) target bundleno = 1 (0x1), region = 112 }

// kernel: svd_head_forward.1
= control target key start
LH: loop header
LB: loop body
LE: loop exit
PB: predicated region body
PF: predicated region fallthrough
CT: control target
= control target key end

     0   :  { %s585_s12 = smov 0   ;;  %s587_s13 = smov 0   ;;  %s641_s0 = inlined_call_operand.vmem [shape: f32[2,3,256], index: 0, kind: input, shape index: {}]   ;;  %s642_s1 = inlined_call_operand.vmem [shape: f32[2,3,256], index: 1, kind: input, shape index: {}]   ;;  %s643_s2 = inlined_call_operand.vmem [shape: f32[2,1,256], index: 2, kind: input, shape index: {}]   ;;  %s644_s3 = inlined_call_operand.vmem [shape: f32[2,5,7], index: 3, kind: output, shape index: {}]  }
   0x1   :  { %s589_s14 = smov 0  }
   0x2 LB: > { %s25_s15 = sadd.s32 1, %s557_s13  ;;  %p500_p0 = scmp.ge.s32.totalorder %s561_s14, 1  ;;  %s561_s14 = sphi %s589_s14, %s13_s14   ;;  %s557_s13 = sphi %s587_s13, %s648_s13   ;;  %s553_s12 = sphi %s585_s12, %s647_s12  }
   0x3   : > { %p27_p1 = scmp.ge.s32.totalorder %s25_s15, 2  ;;  %p189_p2 = scmp.lt.s32.totalorder %s561_s14, 3 }
   0x5   : > { %s650_s15 = smov (%p27_p1, %s25_s15), 0  ;;  %p190_p3 = pnand %p500_p0, %p189_p2 }
   0x6   : > { %p234_p4 = scmp.lt.s32.totalorder (!%p190_p3), %s553_s12, 1  ;;  %v276_v0 = vlaneseq (!%p190_p3)  ;;  %v563_v3 = vmov (!%p190_p3), 1.0   ;;  %vm270_vm1 = vcmask (!%p190_p3), 53248   ;;  %v564_v12 = vmov (!%p190_p3), 0.0  }
   0x7   : > { %193 = sbr.rel (%p190_p3) target bundleno = 252 (0xfc), region = 32 }
   0x8   : > { %v277_v1 = vshrl.u32 (!%p190_p3), %v276_v0, 7  ;;  %vm603_vm0 = vcmp.lt.s32.totalorder (!%p190_p3), %v276_v0, 256 }
   0x9   : > { %316 = vst.msk [vmem:[#allocation3 + $0x6] ss:$8 sm:$0x3] (!%p190_p3), %vm603_vm0, %v563_v3  ;;  %300 = vst.msk [vmem:[#allocation2 + $0x4] ss:$8 sm:$0x3] (!%p190_p3), %vm603_vm0, %v563_v3 }
   0xa   : > { %v278_v4 = vsub.s32 (!%p190_p3), 0, %v277_v1  ;;  %v282_v5 = vsub.s32 (!%p190_p3), 1, %v277_v1 }
   0xe   : > { %s652_s12 = smov (!%p234_p4, %s553_s12), 1 }
   0xf   : > { %s509_s16 = sshll.u32 %s652_s12, 3  ;;  %s505_s17 = sshll.u32 %s652_s12, 1 }
  0x10   : > { %s241_s20 = scalar_lea.vmem %s641_s0, %s509_s16  ;;  %s251_s23 = scalar_lea.vmem %s642_s1, %s509_s16 }
  0x11   : > { %v272_v6 = vld [vmem:[%s241_s20] sm:$0x77]  ;;  %s260_s26 = scalar_lea.vmem %s643_s2, %s505_s17  ;;  %s623_s29 = scalar_lea.vmem %s644_s3, %s509_s16 }
  0x12   : > { %v273_v7 = vld [vmem:[%s251_s23] sm:$0x77]  ;;  %v303_v8 = vcombine.high %v272_v6, %v272_v6  ;;  %305 = vst [vmem:[#allocation3] sm:$0x7] %v272_v6  ;;  %271 = vst.msk [vmem:[%s623_s29] sm:$0x1f] %vm270_vm1, %v564_v12 }
  0x13   : > { %v308_v9 = vcombine.high %v273_v7, %v273_v7  ;;  %v309_v10 = vrot.slane %v273_v7, 5  ;;  %v274_v11 = vld [vmem:[%s260_s26] sm:$0x3] }
  0x14   : > { %v279_v13 = vrot.slane %v274_v11, %v278_v4  ;;  %v283_v14 = vrot.slane %v274_v11, %v282_v5  ;;  %297 = vst.msk [vmem:[#allocation2 + $0x3] ss:$8 sm:$0x3] %vm603_vm0, %v274_v11  ;;  %306 = vst [vmem:[#allocation3 + $0x8] sm:$0x7] %v303_v8 }
  0x15   : > { %v310_v15 = vrot.slane %v308_v9, 5  ;;  %313 = vst [vmem:[#allocation3] sm:$0x38] %v309_v10 }
  0x16   : > { %v284_v16 = vcombine.low %v279_v13, %v283_v14 }
  0x17   : > { %314 = vst [vmem:[#allocation3 + $0x8] sm:$0x38] %v310_v15 }
  0x18   : > { %v286_v17 = vmul.f32 %v284_v16, %v272_v6 }
  0x19   : > { %v318_v23 = vld [vmem:[%s623_s29] sm:$0x1f] }
  0x1a   : > { %v288_v18 = vcombine.high %v286_v17, %v286_v17  ;;  %290 = vst [vmem:[#allocation2] sm:$0x7] %v286_v17 }
  0x1c   : > { %291 = vst [vmem:[#allocation2 + $0x8] sm:$0x7] %v288_v18  ;;  %v321_v19 = vld [vmem:[#allocation3] sm:$0x7f] }
  0x1e   : > { %v322_v20 = vld [vmem:[#allocation3 + $0x8] sm:$0x7f] }
  0x1f   : > { %323 = vmatprep.subr.mxu0 %v322_v20 }
  0x20   : > { %324 = vmatpush1.xpose.msra.mxu0 %v321_v19 }
  0x21   : > { %v319_v21 = vld [vmem:[#allocation2] sm:$0x1f] }
  0x23   : > { %v320_v22 = vld [vmem:[#allocation2 + $0x8] sm:$0x1f] }
  0x24   : > { %387 = vmatprep.mubr.f32.mxu0 %v320_v22 }
  0x25   : > { %388 = vmatmul.mubr.f32.vlgmr.msra.gmra.mrb[0].mxu0 %v319_v21 }
  0xf8   : > { %v389_v24 = vpop.f32.mrb[0].mxu0 }
  0xf9   : > { %v393_v25 = vadd.f32 %v389_v24, %v318_v23  ;;  %v391_v26 = vpop.f32.mrb[1].mxu0 }
  0xfb   : > { %395 = vst.msk [vmem:[%s623_s29] sm:$0x1f] %vm270_vm1, %v393_v25 }
  0xfc PF: > { %s13_s14 = sadd.s32 1, %s561_s14   ;;  %s647_s12 = smov %s557_s13 }
  0xfd   : > { %p10_p5 = scmp.ge.s32.totalorder %s13_s14, 4   ;;  %s648_s13 = smov %s650_s15 }
  0xff   :  { %12 = sbr.rel (!%p10_p5) target bundleno = 2 (0x2), region = 75 }

// kernel: custom-call.50
= control target key start
LH: loop header
LB: loop body
LE: loop exit
PB: predicated region body
PF: predicated region fallthrough
CT: control target
= control target key end

     0   :  { %s6_s0 = inlined_call_operand.hbm [shape: pred[2], index: 0, kind: output, shape index: {}]  }

// kernel: custom-call.55
= control target key start
LH: loop header
LB: loop body
LE: loop exit
PB: predicated region body
PF: predicated region fallthrough
CT: control target
= control target key end

     0   :  { %s343_s6 = smov 0   ;;  %s345_s7 = smov 0   ;;  %s390_s0 = inlined_call_operand.vmem [shape: f32[2,3,3], index: 0, kind: input, shape index: {}]   ;;  %s391_s1 = inlined_call_operand.vmem [shape: f32[2,3,3], index: 1, kind: output, shape index: {}]  }
   0x1   :  { %s347_s8 = smov 0  }
   0x2 LB: > { %s265_s9 = sadd.s32 4294967295, %s330_s8   ;;  %s26_s10 = sadd.s32 1, %s326_s7  ;;  %s330_s8 = sphi %s347_s8, %s7_s8   ;;  %s326_s7 = sphi %s345_s7, %s393_s7   ;;  %s322_s6 = sphi %s343_s6, %s392_s6  }
   0x3   : > { %p28_p0 = scmp.ge.s32.totalorder %s26_s10, 2  ;;  %p267_p1 = scmp.ge.s32.totalorder %s330_s8, 2 }
   0x4   : > { %s42_s11 = sand.u32 (!%p267_p1), 1, %s330_s8   ;;  %s269_s12 = sshll.u32 (!%p267_p1), %s326_s7, 2 }
   0x5   : > { %s395_s10 = smov (%p28_p0, %s26_s10), 0  ;;  %40 = sbr.rel (%p267_p1) target bundleno = 12 (0xc), region = 16 }
   0x6   : > { %s268_s13 = sshll.u32 (!%p267_p1), %s42_s11, 2  ;;  %s48_s16 = scalar_lea.vmem (!%p267_p1), %s390_s0, %s269_s12 }
   0x7   : > { %v64_v0 = vld [vmem:[%s48_s16] sm:$0xf] (!%p267_p1)  ;;  %s44_s17 = scalar_lea.vmem (!%p267_p1), [#allocation1], %s268_s13 }
   0x8   : > { %65 = vst [vmem:[%s44_s17] sm:$0xf] (!%p267_p1), %v64_v0 }
   0xc PF: > { %p270_p2 = scmp.ge.s32.totalorder %s330_s8, 1  ;;  %p81_p3 = scmp.lt.s32.totalorder %s330_s8, 3 }
   0xe   : > { %p82_p4 = pnand %p270_p2, %p81_p3 }
   0xf   : > { %v332_v1 = vmov (!%p82_p4), 0.0   ;;  %s370_s18 = sand.u32 (!%p82_p4), 1, %s265_s9   ;;  %vm104_vm0 = vcmask (!%p82_p4), 7168   ;;  %vm122_vm1 = vcmask (!%p82_p4), 15368   ;;  %vm139_vm2 = vcmask (!%p82_p4), 1047553   ;;  %s274_s22 = sshll.u32 (!%p82_p4), %s322_s6, 2 }
  0x10   : > { %85 = sbr.rel (%p82_p4) target bundleno = 541 (0x21d), region = 50  ;;  %103 = vst [vmem:[#allocation2] sm:$0xff] (!%p82_p4), %v332_v1  ;;  %s271_s19 = sshll.u32 (!%p82_p4), %s370_s18, 2  ;;  %vm140_vm3 = vmand (!%p82_p4), %vm122_vm1, %vm139_vm2  ;;  %vm144_vm4 = vcmask (!%p82_p4), 23568   ;;  %vm161_vm5 = vcmask (!%p82_p4), 1047554  }
  0x11   : > { %s94_s20 = scalar_lea.vmem (!%p82_p4), [#allocation1], %s271_s19  ;;  %vm162_vm6 = vmand (!%p82_p4), %vm144_vm4, %vm161_vm5  ;;  %s98_s21 = scalar_lea.vmem (!%p82_p4), [#allocation3], %s271_s19 }
  0x12   : > { %v101_v5 = vld [vmem:[%s94_s20] sm:$0xf] (!%p82_p4)  ;;  %s179_s25 = scalar_lea.vmem (!%p82_p4), %s391_s1, %s274_s22 }
  0x13   : > { %102 = vst [vmem:[#allocation0] sm:$0xf] (!%p82_p4), %v101_v5 }
  0x17   : > { %v105_v2 = vld [vmem:[#allocation2] ss:$0 sm:$0xff] }
  0x18   : > { %v107_v3 = vmul.f32 %v105_v2, %v105_v2  ;;  %v114_v4 = vmul.f32 0.0, %v105_v2 }
  0x1a   : > { %108 = vadd.xlane.f32.xlu0 %v107_v3  ;;  %v106_v6 = vld [vmem:[#allocation0] ss:$0 sm:$0xff]  ;;  %v126_v18 = vld [vmem:[#allocation0 + $0x1] ss:$0 sm:$0xff]  ;;  %v148_v30 = vld [vmem:[#allocation0 + $0x2] ss:$0 sm:$0xff] }
  0x1b   : > { %v112_v10 = vld [vmem:[#allocation0] sm:$0xff] }
  0x1e   : > { %115 = vadd.xlane.f32.xlu0 %v114_v4 }
  0xa7   : > { %v109_v7 = vpop.xlane.xlu0 %108 }
  0xa8   : > { %v110_v8 = vsub.f32 %v106_v6, %v109_v7 }
  0xaa   : > { %302 = vrsqrt.f32 %v110_v8 }
  0xab   : > { %v116_v9 = vpop.xlane.xlu0 %115 }
  0xac   : > { %v117_v11 = vsub.f32 %v112_v10, %v116_v9 }
  0xb4   : > { %v303_v12 = vpop.eup %302 }
  0xb5   : > { %v118_v13 = vmul.f32 %v303_v12, %v117_v11 }
  0xb7   : > { %v119_v14 = vsel %vm104_vm0, %v118_v13, 0.0 }
  0xb8   : > { %121 = vst [vmem:[#allocation2] sm:$0xff] %v119_v14 }
  0xbf   : > { %v124_v15 = vld [vmem:[#allocation2 + $0x1] ss:$0 sm:$0xff] }
  0xc0   : > { %v127_v16 = vmul.f32 %v124_v15, %v124_v15  ;;  %v134_v17 = vmul.f32 %v124_v15, %v119_v14 }
  0xc2   : > { %128 = vadd.xlane.f32.xlu1 %v127_v16 }
  0xc6   : > { %135 = vadd.xlane.f32.xlu1 %v134_v17 }
 0x14f   : > { %v129_v19 = vpop.xlane.xlu1 %128 }
 0x150   : > { %v130_v20 = vsub.f32 %v126_v18, %v129_v19 }
 0x152   : > { %304 = vrsqrt.f32 %v130_v20 }
 0x153   : > { %v136_v21 = vpop.xlane.xlu1 %135 }
 0x154   : > { %v137_v22 = vsub.f32 %v112_v10, %v136_v21 }
 0x15c   : > { %v305_v23 = vpop.eup %304 }
 0x15d   : > { %v138_v24 = vmul.f32 %v305_v23, %v137_v22 }
 0x15f   : > { %v141_v25 = vsel %vm140_vm3, %v138_v24, 0.0 }
 0x160   : > { %v142_v26 = vadd.f32 %v141_v25, %v119_v14 }
 0x162   : > { %143 = vst [vmem:[#allocation2] sm:$0xff] %v142_v26 }
 0x169   : > { %v146_v27 = vld [vmem:[#allocation2 + $0x2] ss:$0 sm:$0xff] }
 0x16a   : > { %v156_v28 = vmul.f32 %v146_v27, %v142_v26  ;;  %v149_v29 = vmul.f32 %v146_v27, %v146_v27 }
 0x16c   : > { %157 = vadd.xlane.f32.xlu1 %v156_v28  ;;  %150 = vadd.xlane.f32.xlu0 %v149_v29 }
 0x1f9   : > { %v151_v31 = vpop.xlane.xlu0 %150  ;;  %v158_v33 = vpop.xlane.xlu1 %157 }
 0x1fa   : > { %v152_v32 = vsub.f32 %v148_v30, %v151_v31  ;;  %v159_v34 = vsub.f32 %v112_v10, %v158_v33 }
 0x1fc   : > { %306 = vrsqrt.f32 %v152_v32 }
 0x206   : > { %v307_v35 = vpop.eup %306 }
 0x207   : > { %v160_v36 = vmul.f32 %v307_v35, %v159_v34 }
 0x209   : > { %v163_v37 = vsel %vm162_vm6, %v160_v36, 0.0 }
 0x20a   : > { %v164_v38 = vadd.f32 %v163_v37, %v142_v26 }
 0x20c   : > { %165 = vst [vmem:[#allocation2] sm:$0xff] %v164_v38 }
 0x213   : > { %v169_v39 = vld [vmem:[#allocation2] sm:$0xf] }
 0x214   : > { %171 = vst [vmem:[%s98_s21] sm:$0xf] %v169_v39 }
 0x21b   : > { %v195_v40 = vld [vmem:[%s98_s21] sm:$0xf] }
 0x21c   : > { %196 = vst [vmem:[%s179_s25] sm:$0xf] %v195_v40 }
 0x21d PF: > { %s7_s8 = sadd.s32 1, %s330_s8   ;;  %s392_s6 = smov %s326_s7 }
 0x21e   : > { %p4_p5 = scmp.ge.s32.totalorder %s7_s8, 4   ;;  %s393_s7 = smov %s395_s10 }
 0x220   :  { %6 = sbr.rel (!%p4_p5) target bundleno = 2 (0x2), region = 114 }

// kernel: custom-call.56
= control target key start
LH: loop header
LB: loop body
LE: loop exit
PB: predicated region body
PF: predicated region fallthrough
CT: control target
= control target key end

     0   :  { %s343_s6 = smov 0   ;;  %s345_s7 = smov 0   ;;  %s390_s0 = inlined_call_operand.vmem [shape: f32[2,1,3,3], index: 0, kind: input, shape index: {}]   ;;  %s391_s1 = inlined_call_operand.vmem [shape: f32[2,1,3,3], index: 1, kind: output, shape index: {}]  }
   0x1   :  { %s347_s8 = smov 0  }
   0x2 LB: > { %s269_s9 = sadd.s32 4294967295, %s330_s8   ;;  %s33_s10 = sadd.s32 1, %s326_s7  ;;  %s330_s8 = sphi %s347_s8, %s7_s8   ;;  %s326_s7 = sphi %s345_s7, %s393_s7   ;;  %s322_s6 = sphi %s343_s6, %s392_s6  }
   0x3   : > { %p35_p0 = scmp.ge.s32.totalorder %s33_s10, 2  ;;  %p271_p1 = scmp.ge.s32.totalorder %s330_s8, 2 }
   0x4   : > { %s49_s11 = sand.u32 (!%p271_p1), 1, %s330_s8   ;;  %s273_s12 = sshll.u32 (!%p271_p1), %s326_s7, 2 }
   0x5   : > { %s395_s10 = smov (%p35_p0, %s33_s10), 0  ;;  %47 = sbr.rel (%p271_p1) target bundleno = 12 (0xc), region = 16 }
   0x6   : > { %s272_s13 = sshll.u32 (!%p271_p1), %s49_s11, 2  ;;  %s56_s16 = scalar_lea.vmem (!%p271_p1), %s390_s0, %s273_s12 }
   0x7   : > { %v72_v0 = vld [vmem:[%s56_s16] sm:$0xf] (!%p271_p1)  ;;  %s51_s17 = scalar_lea.vmem (!%p271_p1), [#allocation1], %s272_s13 }
   0x8   : > { %73 = vst [vmem:[%s51_s17] sm:$0xf] (!%p271_p1), %v72_v0 }
   0xc PF: > { %p274_p2 = scmp.ge.s32.totalorder %s330_s8, 1  ;;  %p89_p3 = scmp.lt.s32.totalorder %s330_s8, 3 }
   0xe   : > { %p90_p4 = pnand %p274_p2, %p89_p3 }
  0x10   : > { %93 = sbr.rel (%p90_p4) target bundleno = 511 (0x1ff), region = 50 }
  0x17   : > { %s370_s18 = sand.u32 1, %s269_s9   ;;  %v111_v1 = vlaneseq  ;;  %v332_v11 = vmov -1.0   ;;  %s278_s22 = sshll.u32 %s322_s6, 2 }
  0x18   : > { %s275_s19 = sshll.u32 %s370_s18, 2  ;;  %s178_s25 = scalar_lea.vmem %s391_s1, %s278_s22 }
  0x19   : > { %s102_s20 = scalar_lea.vmem [#allocation1], %s275_s19  ;;  %v112_v3 = vand.u32 127, %v111_v1  ;;  %v115_v4 = vshrl.u32 %v111_v1, 7  ;;  %s106_s21 = scalar_lea.vmem [#allocation3], %s275_s19 }
  0x1a   : > { %v109_v2 = vld [vmem:[%s102_s20] sm:$0xf] }
  0x1b   : > { %110 = vst [vmem:[#allocation0] sm:$0xf] %v109_v2  ;;  %vm113_vm0 = vcmp.lt.s32.totalorder %v112_v3, 3  ;;  %vm122_vm1 = vcmp.ge.s32.totalorder %v115_v4, %v112_v3  ;;  %vm117_vm2 = vcmp.eq.s32.totalorder %v115_v4, %v112_v3  ;;  %vm136_vm4 = vcmp.eq.s32.totalorder %v112_v3, 0 }
  0x1c   : > { %vm123_vm3 = vmand %vm122_vm1, %vm113_vm0  ;;  %vm133_vm5 = vcmp.eq.s32.totalorder %v112_v3, %v115_v4  ;;  %v137_v12 = vsel %vm136_vm4, 1.0, %v332_v11  ;;  %vm144_vm6 = vcmp.eq.s32.totalorder %v112_v3, 1  ;;  %vm154_vm7 = vcmp.eq.s32.totalorder %v112_v3, 2 }
  0x1d   : > { %v138_v13 = vsel %vm133_vm5, %v137_v12, 0.0 }
  0x22   : > { %v118_v5 = vld [vmem:[#allocation0] sm:$0xff] }
  0x23   : > { %v119_v6 = vsel %vm117_vm2, %v118_v5, 0.0  ;;  %v124_v7 = vsel %vm123_vm3, %v118_v5, 0.0 }
  0x24   : > { %120 = vadd.xlane.f32.xlu0 %v119_v6 }
  0xb1   : > { %v121_v8 = vpop.xlane.xlu0 %120 }
  0xb2   : > { %306 = vrcp.f32 %v121_v8  ;;  %vm161_vm8 = vweird.f32 %v121_v8 }
  0xbc   : > { %v307_v9 = vpop.eup %306 }
  0xbd   : > { %v126_v10 = vmul.f32 %v307_v9, %v124_v7 }
  0xbf   : > { %127 = vst [vmem:[#allocation4] sm:$0xff] %v126_v10 }
  0xc6   : > { %v140_v14 = vld [vmem:[#allocation4 + $0x1] ss:$0 sm:$0xff]  ;;  %v150_v17 = vld [vmem:[#allocation4 + $0x2] ss:$0 sm:$0xff] }
  0xc7   : > { %v141_v15 = vxor.u32 2147483648, %v140_v14  ;;  %v151_v19 = vxor.u32 2147483648, %v150_v17 }
  0xc9   : > { %v145_v16 = vmul.f32 %v141_v15, %v138_v13 }
  0xcb   : > { %146 = vadd.xlane.f32.xlu0 %v145_v16 }
 0x158   : > { %v147_v18 = vpop.xlane.xlu0 %146 }
 0x159   : > { %v148_v20 = vsel %vm144_vm6, %v147_v18, %v138_v13 }
 0x15a   : > { %v155_v21 = vmul.f32 %v151_v19, %v148_v20 }
 0x15c   : > { %156 = vadd.xlane.f32.xlu1 %v155_v21 }
 0x1e9   : > { %v157_v22 = vpop.xlane.xlu1 %156 }
 0x1ea   : > { %v158_v23 = vsel %vm154_vm7, %v157_v22, %v148_v20 }
 0x1eb   : > { %v160_v24 = vmul.f32 %v307_v9, %v158_v23 }
 0x1ed   : > { %v162_v25 = vsel %vm161_vm8, %v158_v23, %v160_v24 }
 0x1ee   : > { %163 = vst [vmem:[#allocation2] sm:$0xff] %v162_v25 }
 0x1f5   : > { %v167_v26 = vld [vmem:[#allocation2] sm:$0xf] }
 0x1f6   : > { %169 = vst [vmem:[%s106_s21] sm:$0xf] %v167_v26 }
 0x1fd   : > { %v194_v27 = vld [vmem:[%s106_s21] sm:$0xf] }
 0x1fe   : > { %195 = vst [vmem:[%s178_s25] sm:$0xf] %v194_v27 }
 0x1ff PF: > { %s7_s8 = sadd.s32 1, %s330_s8   ;;  %s392_s6 = smov %s326_s7 }
 0x200   : > { %p4_p5 = scmp.ge.s32.totalorder %s7_s8, 4   ;;  %s393_s7 = smov %s395_s10 }
 0x202   :  { %6 = sbr.rel (!%p4_p5) target bundleno = 2 (0x2), region = 112 }

// kernel: custom-call.22
= control target key start
LH: loop header
LB: loop body
LE: loop exit
PB: predicated region body
PF: predicated region fallthrough
CT: control target
= control target key end

     0   :  { %s1704_s30 = smov 0   ;;  %s1706_s10 = smov 0   ;;  %s2030_s0 = inlined_call_operand.vmem [shape: f32[2,2,2], index: 0, kind: input, shape index: {}]   ;;  %s2031_s1 = inlined_call_operand.vmem [shape: f32[2,2,2], index: 1, kind: input, shape index: {}]   ;;  %s2032_s2 = inlined_call_operand.vmem [shape: f32[2,2,2], index: 2, kind: input, shape index: {}]   ;;  %s2033_s3 = inlined_call_operand.vmem [shape: f32[2,2,2], index: 3, kind: input, shape index: {}]   ;;  %s2034_s4 = inlined_call_operand.vmem [shape: f32[2,2], index: 4, kind: output, shape index: {0}]   ;;  %s2035_s5 = inlined_call_operand.vmem [shape: f32[2,2], index: 5, kind: output, shape index: {1}]   ;;  %s2036_s6 = inlined_call_operand.vmem [shape: f32[2,2,2], index: 6, kind: output, shape index: {2}]   ;;  %s2037_s7 = inlined_call_operand.vmem [shape: f32[2,2,2], index: 7, kind: output, shape index: {3}]   ;;  %s2038_s8 = inlined_call_operand.vmem [shape: f32[2,2,2], index: 8, kind: output, shape index: {4}]   ;;  %s2039_s9 = inlined_call_operand.vmem [shape: f32[2,2,2], index: 9, kind: output, shape index: {5}]  }
   0x1   :  { %s1708_s11 = smov 0  }
   0x2 LB: > { %s1720_s12 = sadd.s32 4294967295, %s1641_s11   ;;  %s1723_s13 = sadd.s32 1, %s1641_s11   ;;  %s1641_s11 = sphi %s1708_s11, %s2058_s11   ;;  %s1637_s10 = sphi %s1706_s10, %s2057_s10   ;;  %s1633_s30 = sphi %s1704_s30, %s2056_s30  }
   0x3   : > { %s20_s14 = sshrl.u32 %s1641_s11, 3  ;;  %s21_s15 = sshrl.u32 %s1723_s13, 3 }
   0x4   : > { %s22_s16 = ssub.s32 %s20_s14, %s21_s15  ;;  %s25_s17 = sadd.s32 1, %s1637_s10 }
   0x5   : > { %p23_p0 = scmp.eq.s32.totalorder %s22_s16, 0  ;;  %p35_p1 = scmp.ne.s32.totalorder %s1637_s10, %s1633_s30 }
   0x6   : > { %p36_p2 = scmp.eq.s32.totalorder %s1720_s12, 1  ;;  %p1502_p4 = scmp.ge.s32.totalorder %s1641_s11, 2 }
   0x7   : > { %s1732_s18 = scalar_select %p23_p0, %s1637_s10, %s25_s17  }
   0x8   : > { %p1734_p3 = por %p36_p2, %p35_p1  ;;  %86 = sbr.rel (%p1502_p4) target bundleno = 17 (0x11), region = 16 }
   0x9   : > { %2040 = sst [smem:[#allocation33_spill]] %s1732_s18  ;;  %s88_s20 = sand.u32 (!%p1502_p4), 1, %s1641_s11  }
   0xa   : > { %s1504_s21 = sshll.u32 (!%p1502_p4), %s1641_s11, 1  ;;  %s1503_s22 = sshll.u32 (!%p1502_p4), %s88_s20, 1 }
   0xb   : > { %s92_s25 = scalar_lea.vmem (!%p1502_p4), %s2030_s0, %s1504_s21  ;;  %s90_s26 = scalar_lea.vmem (!%p1502_p4), [#allocation1], %s1503_s22 }
   0xc   : > { %v108_v0 = vld [vmem:[%s92_s25] sm:$0x3] (!%p1502_p4)  ;;  %s129_s29 = scalar_lea.vmem (!%p1502_p4), %s2031_s1, %s1504_s21  ;;  %s166_s16 = scalar_lea.vmem (!%p1502_p4), %s2032_s2, %s1504_s21 }
   0xd   : > { %109 = vst [vmem:[%s90_s26] sm:$0x3] (!%p1502_p4), %v108_v0  ;;  %v145_v1 = vld [vmem:[%s129_s29] sm:$0x3] (!%p1502_p4)  ;;  %s127_s17 = scalar_lea.vmem (!%p1502_p4), [#allocation3], %s1503_s22  ;;  %s203_s23 = scalar_lea.vmem (!%p1502_p4), %s2033_s3, %s1504_s21 }
   0xe   : > { %146 = vst [vmem:[%s127_s17] sm:$0x3] (!%p1502_p4), %v145_v1  ;;  %v182_v2 = vld [vmem:[%s166_s16] sm:$0x3] (!%p1502_p4)  ;;  %s164_s24 = scalar_lea.vmem (!%p1502_p4), [#allocation5], %s1503_s22  ;;  %s201_s25 = scalar_lea.vmem (!%p1502_p4), [#allocation7], %s1503_s22 }
   0xf   : > { %183 = vst [vmem:[%s164_s24] sm:$0x3] %v182_v2  ;;  %v219_v3 = vld [vmem:[%s203_s23] sm:$0x3] }
  0x10   : > { %220 = vst [vmem:[%s201_s25] sm:$0x3] %v219_v3 }
  0x11 PF: > { %p1511_p5 = scmp.ge.s32.totalorder %s1641_s11, 1  ;;  %p236_p6 = scmp.lt.s32.totalorder %s1641_s11, 3 }
  0x13   : > { %p237_p7 = pnand %p1511_p5, %p236_p6 }
  0x15   : > { %240 = sbr.rel (%p237_p7) target bundleno = 999 (0x3e7), region = 140 }
  0x1c   : > { %s259_s26 = sand.u32 1, %s1720_s12   ;;  %s277_s27 = sand.u32 1, %s1633_s30   ;;  %v337_v4 = vlaneseq  ;;  %v1651_v5 = vmov 0.0  }
  0x1d   : > { %s1757_s28 = sshll.u32 %s259_s26, 1  ;;  %s1759_s18 = sshll.u32 %s277_s27, 1  ;;  %332 = vst [vmem:[#allocation12] sm:$0xff] %v1651_v5  ;;  %333 = vst [vmem:[#allocation14] sm:$0xff] %v1651_v5 }
  0x1e   : > { %334 = vst [vmem:[#allocation16] sm:$0xff] %v1651_v5  ;;  %335 = vst [vmem:[#allocation18] sm:$0xff] %v1651_v5  ;;  %v1761_v6 = vand.u32 127, %v337_v4  ;;  %v1763_v7 = vshrl.u32 %v337_v4, 7  ;;  %s261_s11 = scalar_lea.vmem [#allocation1], %s1757_s28  ;;  %s265_s30 = scalar_lea.vmem [#allocation3], %s1757_s28 }
  0x1f   : > { %v304_v8 = vld [vmem:[%s261_s11] sm:$0x3]  ;;  %v308_v9 = vld [vmem:[%s265_s30] sm:$0x3]  ;;  %s269_s21 = scalar_lea.vmem [#allocation5], %s1757_s28  ;;  %s273_s22 = scalar_lea.vmem [#allocation7], %s1757_s28 }
  0x20   : > { %305 = vst [vmem:[#allocation0] sm:$0x3] %v304_v8  ;;  %309 = vst [vmem:[#allocation2] sm:$0x3] %v308_v9  ;;  %v312_v10 = vld [vmem:[%s269_s21] sm:$0x3]  ;;  %v339_v6 = vmov %v1761_v6  ;;  %v342_v7 = vmov %v1763_v7 }
  0x21   : > { %v316_v11 = vld [vmem:[%s273_s22] sm:$0x3]  ;;  %313 = vst [vmem:[#allocation4] sm:$0x3] %v312_v10  ;;  %v352_v6 = vmov %v1761_v6  ;;  %v355_v7 = vmov %v1763_v7  ;;  %s320_s29 = smov [#allocation20]  ;;  %s323_s14 = smov [#allocation21]  ;;  %vm346_vm0 = vcmp.eq.s32.totalorder %v342_v7, %v339_v6 }
  0x22   : > { %317 = vst [vmem:[#allocation6] sm:$0x3] %v316_v11  ;;  %vm359_vm1 = vcmp.eq.s32.totalorder %v355_v7, %v352_v6  ;;  %s336_s15 = smov [#allocation12]  ;;  %s349_s16 = smov [#allocation18]  ;;  %vm1391_vm2 = vcmp.lt.s32.totalorder %v1761_v6, 2  ;;  %v1383_v6 = vmov %v1761_v6  ;;  %v1386_v7 = vmov %v1763_v7 }
  0x23   : > { %s326_s17 = smov [#allocation22]  ;;  %s329_s20 = smov [#allocation23]  ;;  %vm1396_vm3 = vcmp.eq.s32.totalorder %v1386_v7, %v1383_v6  ;;  %v1434_v6 = vmov %v1761_v6  ;;  %v1403_v7 = vmov %v1763_v7 }
  0x24   : > { %v343_v12 = vld [vmem:[%s336_s15] sm:$0x3]  ;;  %s1387_s30 = smov [#allocation20]  ;;  %s1404_s21 = smov [#allocation21]  ;;  %v1400_v6 = vmov %v1761_v6  ;;  %v1437_v7 = vmov %v1763_v7 }
  0x25   : > { %v356_v13 = vld [vmem:[%s349_s16] sm:$0x3]  ;;  %v347_v16 = vsel %vm346_vm0, 1.0, %v343_v12  ;;  %s1421_s22 = smov [#allocation22]  ;;  %v1417_v6 = vmov %v1761_v6  ;;  %v1420_v7 = vmov %v1763_v7  ;;  %vm1447_vm4 = vcmp.eq.s32.totalorder %v1437_v7, %v1434_v6 }
  0x26   : > { %v360_v17 = vsel %vm359_vm1, 1.0, %v356_v13  ;;  %348 = vst [vmem:[%s336_s15] sm:$0x3] %v347_v16 }
  0x27   : > { %v321_v14 = vld [vmem:[#allocation0] sm:$0xff]  ;;  %v324_v15 = vld [vmem:[#allocation2] sm:$0xff]  ;;  %361 = vst [vmem:[%s349_s16] sm:$0x3] %v360_v17 }
  0x28   : > { %322 = vst [vmem:[%s320_s29] sm:$0xff] %v321_v14  ;;  %325 = vst [vmem:[%s323_s14] sm:$0xff] %v324_v15  ;;  %v327_v18 = vld [vmem:[#allocation4] sm:$0xff]  ;;  %s1438_s29 = smov [#allocation23] }
  0x29   : > { %v330_v19 = vld [vmem:[#allocation6] sm:$0xff]  ;;  %328 = vst [vmem:[%s326_s17] sm:$0xff] %v327_v18 }
  0x2a   : > { %331 = vst [vmem:[%s329_s20] sm:$0xff] %v330_v19 }
  0x2f   : > { %v1393_v20 = vld [vmem:[%s1387_s30] sm:$0x3] }
  0x30   : > { %v1410_v21 = vld [vmem:[%s1404_s21] sm:$0x3]  ;;  %v1394_v22 = vsel %vm1391_vm2, %v1393_v20, 0.0 }
  0x31   : > { %v1411_v23 = vsel %vm1391_vm2, %v1410_v21, 0.0  ;;  %v1427_v24 = vld [vmem:[%s1421_s22] sm:$0x3]  ;;  %v1395_v26 = vmul.f32 %v1394_v22, %v1394_v22 }
  0x32   : > { %v1444_v25 = vld [vmem:[%s1438_s29] sm:$0x3]  ;;  %v1412_v27 = vmul.f32 %v1411_v23, %v1411_v23  ;;  %v1428_v28 = vsel %vm1391_vm2, %v1427_v24, 0.0 }
  0x33   : > { %v1445_v29 = vsel %vm1391_vm2, %v1444_v25, 0.0  ;;  %v1429_v30 = vmul.f32 %v1428_v28, %v1428_v28  ;;  %v1397_v33 = vsel %vm1396_vm3, 0.0, %v1395_v26 }
  0x34   : > { %v1414_v31 = vadd.f32 %v1412_v27, %v1395_v26  ;;  %v1446_v32 = vmul.f32 %v1445_v29, %v1445_v29  ;;  %v1413_v34 = vadd.f32 %v1412_v27, %v1397_v33 }
  0x36   : > { %v1431_v35 = vadd.f32 %v1429_v30, %v1414_v31  ;;  %v1430_v36 = vadd.f32 %v1429_v30, %v1413_v34  ;;  %v1448_v37 = vsel %vm1447_vm4, 0.0, %v1446_v32 }
  0x38   : > { %v1450_v38 = vadd.f32 %v1446_v32, %v1431_v35  ;;  %v1449_v39 = vadd.f32 %v1448_v37, %v1430_v36 }
  0x3a   : > { %1451 = vadd.xlane.f32.xlu0 %v1450_v38 }
  0x3e   : > { %1459 = vadd.xlane.f32.xlu0 %v1449_v39 }
  0xc7   : > { %v1452_v40 = vpop.xlane.xlu0 %1451 }
  0xc8   : > { %v1453_v41 = vrot.slane %v1452_v40, 4 }
  0xca   : > { %v1454_v42 = vadd.f32 %v1453_v41, %v1452_v40 }
  0xcb   : > { %v1460_v43 = vpop.xlane.xlu0 %1459 }
  0xcc   : > { %v1455_v44 = vrot.slane %v1454_v42, 2  ;;  %v1461_v45 = vrot.slane %v1460_v43, 4 }
  0xce   : > { %v1462_v46 = vadd.f32 %v1461_v45, %v1460_v43  ;;  %v1456_v47 = vadd.f32 %v1455_v44, %v1454_v42 }
  0xd0   : > { %v1463_v48 = vrot.slane %v1462_v46, 2  ;;  %v1457_v50 = vrot.slane %v1456_v47, 1 }
  0xd2   : > { %v1464_v49 = vadd.f32 %v1463_v48, %v1462_v46  ;;  %v1458_v53 = vadd.f32 %v1457_v50, %v1456_v47 }
  0xd4   : > { %v1465_v51 = vrot.slane %v1464_v49, 1 }
  0xd6   : > { %v1466_v52 = vadd.f32 %v1465_v51, %v1464_v49 }
  0xd8   : > { %1552 = vpush %v1466_v52 }
  0xd9   : > { %1554 = vpush %v1458_v53 }
 0x109   : > { %s1553_s14 = spop %1552 }
 0x10a   : > { %s1555_s15 = spop %1554 }
 0x10b   : > { %s1469_s16 = smul.f32 1e-10, %s1555_s15 }
 0x10d   : > { %p1470_p8 = scmp.le.f32.partialorder %s1553_s14, %s1469_s16 }
 0x10e   : > { %s1797_s17 = smov (!%p1470_p8), 0  }
 0x10f   : > { %1473 = sbr.rel (%p1470_p8) target bundleno = 953 (0x3b9), region = 467 }
 0x116 LB: >> { %s1802_s20 = smov 0   ;;  %s1645_s17 = sphi %s1797_s17, %s2042_s17  }
 0x117 LB: >>> { %s466_s30 = smov [#allocation20]  ;;  %v470_v6 = vmov %v1761_v6  ;;  %v473_v7 = vmov %v1763_v7  ;;  %s486_s21 = smov [#allocation21]  ;;  %vm789_vm14 = vcmp.eq.s32.totalorder %v1763_v7, 0  ;;  %vm801_vm15 = vcmp.eq.s32.totalorder %v1763_v7, 1  ;;  %s1649_s20 = sphi %s1802_s20, %s465_s20  }
 0x118   : >>> { %v490_v6 = vmov %v1761_v6  ;;  %v493_v7 = vmov %v1763_v7  ;;  %v474_v54 = vld [vmem:[%s466_s30] sm:$0x3]  ;;  %vm477_vm5 = vcmp.eq.s32.totalorder %v473_v7, %v470_v6  ;;  %s506_s22 = smov [#allocation23]  ;;  %s467_s29 = smov [#allocation24] }
 0x119   : >>> { %vm497_vm6 = vcmp.eq.s32.totalorder %v493_v7, %v490_v6  ;;  %v510_v6 = vmov %v1761_v6  ;;  %v513_v7 = vmov %v1763_v7  ;;  %v478_v55 = vsel %vm477_vm5, %v474_v54, 0.0  ;;  %v494_v56 = vld [vmem:[%s486_s21] sm:$0x3]  ;;  %s487_s14 = smov [#allocation25]  ;;  %s507_s15 = smov [#allocation26] }
 0x11a   : >>> { %vm517_vm7 = vcmp.eq.s32.totalorder %v513_v7, %v510_v6  ;;  %v479_v57 = vrot.slane %v478_v55, 4  ;;  %v498_v58 = vsel %vm497_vm6, %v494_v56, 0.0  ;;  %v514_v59 = vld [vmem:[%s506_s22] sm:$0x3]  ;;  %s530_s16 = smov [#allocation25]  ;;  %s528_s30 = smov [#allocation24]  ;;  %v579_v6 = vmov %v1761_v6 }
 0x11b   : >>> { %v499_v60 = vrot.slane %v498_v58, 4  ;;  %v518_v61 = vsel %vm517_vm7, %v514_v59, 0.0  ;;  %s532_s21 = smov [#allocation26]  ;;  %s567_s22 = smov [#allocation27]  ;;  %v582_v7 = vmov %v1763_v7  ;;  %v594_v6 = vmov %v1761_v6 }
 0x11c   : >>> { %v480_v62 = vadd.f32 %v479_v57, %v478_v55  ;;  %v519_v63 = vrot.slane %v518_v61, 4  ;;  %v597_v7 = vmov %v1763_v7  ;;  %vm584_vm12 = vcmp.eq.s32.totalorder %v582_v7, %v579_v6  ;;  %s1821_s24 = smov [#allocation22]  ;;  %s1827_s23 = smov [#allocation14] }
 0x11d   : >>> { %v500_v0 = vadd.f32 %v499_v60, %v498_v58  ;;  %vm599_vm13 = vcmp.eq.s32.totalorder %v597_v7, %v594_v6  ;;  %s829_s11 = smov [#allocation31]  ;;  %s1833_s27 = smov [#allocation18]  ;;  %v615_v55 = vld [vmem:[%s1821_s24] sm:$0x3]  ;;  %v692_v6 = vmov %v1761_v6  ;;  %v695_v7 = vmov %v1763_v7 }
 0x11e   : >>> { %v481_v1 = vrot.slane %v480_v62, 2  ;;  %v520_v2 = vadd.f32 %v519_v63, %v518_v61  ;;  %v838_v58 = vld [vmem:[%s1827_s23] sm:$0x3]  ;;  %s607_s26 = smov [#allocation32]  ;;  %s831_s25 = smov [#allocation32]  ;;  %v706_v6 = vmov %v1761_v6  ;;  %v709_v7 = vmov %v1763_v7 }
 0x11f   : >>> { %v501_v3 = vrot.slane %v500_v0, 2  ;;  %v840_v61 = vld [vmem:[%s1833_s27] sm:$0x3]  ;;  %vm699_vm0 = vcmp.eq.s32.totalorder %v695_v7, %v692_v6  ;;  %v665_v6 = vmov %v1761_v6  ;;  %v668_v7 = vmov %v1763_v7  ;;  %s465_s20 = sadd.s32 1, %s1649_s20  }
 0x120   : >>> { %v482_v4 = vadd.f32 %v481_v1, %v480_v62  ;;  %v521_v5 = vrot.slane %v520_v2, 2  ;;  %v679_v6 = vmov %v1761_v6  ;;  %v682_v7 = vmov %v1763_v7  ;;  %p462_p9 = scmp.ge.s32.totalorder %s465_s20, 3  }
 0x121   : >>> { %v502_v8 = vadd.f32 %v501_v3, %v500_v0  ;;  %vm714_vm1 = vcmp.eq.s32.totalorder %v709_v7, %v706_v6  ;;  %vm673_vm3 = vcmp.eq.s32.totalorder %v668_v7, %v665_v6  ;;  %vm686_vm4 = vcmp.eq.s32.totalorder %v682_v7, %v679_v6 }
 0x122   : >>> { %v483_v9 = vrot.slane %v482_v4, 1  ;;  %v522_v10 = vadd.f32 %v521_v5, %v520_v2  ;;  %vm728_vm5 = vcmp.eq.s32.totalorder %v1761_v6, 0  ;;  %vm732_vm6 = vcmp.eq.s32.totalorder %v1761_v6, 1 }
 0x123   : >>> { %v503_v11 = vrot.slane %v502_v8, 1  ;;  %v366_v6 = vmov (%p462_p9), %v1761_v6  ;;  %v369_v7 = vmov (%p462_p9), %v1763_v7 }
 0x124   : >>> { %v484_v12 = vadd.f32 %v483_v9, %v482_v4  ;;  %v523_v13 = vrot.slane %v522_v10, 1  ;;  %v419_v6 = vmov (%p462_p9), %v1761_v6  ;;  %vm381_vm7 = vcmp.eq.s32.totalorder (%p462_p9), %v369_v7, %v366_v6 }
 0x125   : >>> { %v504_v14 = vadd.f32 %v503_v11, %v502_v8  ;;  %v422_v7 = vmov (%p462_p9), %v1763_v7  ;;  %v385_v6 = vmov (%p462_p9), %v1761_v6 }
 0x126   : >>> { %485 = vst [vmem:[%s467_s29] sm:$0x1] %v484_v12  ;;  %v524_v15 = vadd.f32 %v523_v13, %v522_v10  ;;  %s569_s29 = smov [#allocation28]  ;;  %v388_v7 = vmov (%p462_p9), %v1763_v7  ;;  %v402_v6 = vmov (%p462_p9), %v1761_v6 }
 0x127   : >>> { %505 = vst [vmem:[%s487_s14] sm:$0x1] %v504_v14  ;;  %s526_s14 = smov [#allocation29]  ;;  %v405_v7 = vmov (%p462_p9), %v1763_v7 }
 0x128   : >>> { %525 = vst [vmem:[%s507_s15] sm:$0x1] %v524_v15  ;;  %s527_s15 = smov [#allocation30]  ;;  %s571_s14 = smov %s526_s14 }
 0x129   : >>> { %s573_s15 = smov %s527_s15 }
 0x12d   : >>> { %v529_v18 = vld [vmem:[%s528_s30] sm:$0xff]  ;;  %s590_s30 = smov [#allocation30] }
 0x12e   : >>> { %v531_v16 = vld [vmem:[%s530_s16] sm:$0xff]  ;;  %v552_v31 = vand.u32 2147483647, %v529_v18  ;;  %s575_s16 = smov [#allocation29] }
 0x12f   : >>> { %v535_v17 = vmul.f32 2.0, %v531_v16  ;;  %v533_v19 = vld [vmem:[%s532_s21] sm:$0xff]  ;;  %v553_v36 = vand.u32 2147483647, %v531_v16  ;;  %s588_s21 = smov [#allocation31] }
 0x130   : >>> { %v534_v20 = vsub.f32 %v533_v19, %v529_v18  ;;  %v554_v32 = vand.u32 2147483647, %v533_v19 }
 0x131   : >>> { %1603 = vrcp.f32 %v535_v17 }
 0x132   : >>> { %v555_v35 = vmin.f32 %v552_v31, %v554_v32 }
 0x134   : >>> { %v556_v37 = vmul.f32 1.1920929e-08, %v555_v35 }
 0x136   : >>> { %vm557_vm11 = vcmp.le.f32.partialorder %v553_v36, %v556_v37 }
 0x13b   : >>> { %v1604_v21 = vpop.eup %1603 }
 0x13c   : >>> { %v537_v22 = vmul.f32 %v1604_v21, %v534_v20 }
 0x13e   : >>> { %v539_v23 = vmul.f32 %v537_v22, %v537_v22  ;;  %vm538_vm10 = vcmp.ge.f32.partialorder %v537_v22, 0.0 }
 0x140   : >>> { %v540_v24 = vadd.f32 1.0, %v539_v23 }
 0x142   : >>> { %1605 = vrsqrt.f32 %v540_v24  ;;  %vm543_vm8 = vcmp.eq.f32.partialorder %v540_v24, inf  ;;  %v546_v26 = vand.u32 2147483648, %v540_v24  ;;  %vm545_vm9 = vcmp.eq.f32.partialorder %v540_v24, 0.0 }
 0x14c   : >>> { %v1606_v25 = vpop.eup %1605 }
 0x14d   : >>> { %v542_v27 = vmul.f32 %v1606_v25, %v540_v24 }
 0x14f   : >>> { %v544_v28 = vsel %vm543_vm8, %v540_v24, %v542_v27  ;;  %vm434_vm8 = vcmp.eq.s32.totalorder (%p462_p9), %v422_v7, %v419_v6 }
 0x150   : >>> { %v547_v29 = vsel %vm545_vm9, %v546_v26, %v544_v28 }
 0x151   : >>> { %v548_v30 = vxor.u32 2147483648, %v547_v29 }
 0x153   : >>> { %v549_v33 = vsel %vm538_vm10, %v547_v29, %v548_v30 }
 0x154   : >>> { %v550_v34 = vadd.f32 %v549_v33, %v537_v22 }
 0x156   : >>> { %1607 = vrcp.f32 %v550_v34 }
 0x160   : >>> { %v1608_v38 = vpop.eup %1607 }
 0x161   : >>> { %v558_v39 = vsel %vm557_vm11, 0.0, %v1608_v38 }
 0x162   : >>> { %v559_v40 = vmul.f32 %v558_v39, %v558_v39  ;;  %v563_v41 = vmul.f32 %v558_v39, %v531_v16 }
 0x164   : >>> { %v560_v42 = vadd.f32 1.0, %v559_v40  ;;  %v564_v43 = vsub.f32 %v529_v18, %v563_v41  ;;  %v566_v44 = vadd.f32 %v563_v41, %v533_v19 }
 0x166   : >>> { %1609 = vrsqrt.f32 %v560_v42  ;;  %568 = vst [vmem:[%s567_s22] sm:$0xff] %v564_v43  ;;  %570 = vst [vmem:[%s569_s29] sm:$0xff] %v566_v44  ;;  %s605_s22 = smov [#allocation31]  ;;  %s1817_s29 = smov [#allocation20] }
 0x167   : >>> { %v613_v53 = vld [vmem:[%s1817_s29] sm:$0x3] }
 0x170   : >>> { %v1610_v45 = vpop.eup %1609 }
 0x171   : >>> { %572 = vst [vmem:[%s571_s14] sm:$0xff] %v1610_v45  ;;  %v562_v46 = vmul.f32 %v1610_v45, %v558_v39  ;;  %s603_s14 = smov [#allocation32] }
 0x173   : >>> { %574 = vst [vmem:[%s573_s15] sm:$0xff] %v562_v46  ;;  %s1819_s15 = smov [#allocation21] }
 0x174   : >>> { %v614_v54 = vld [vmem:[%s1819_s15] sm:$0x3] }
 0x178   : >>> { %v576_v47 = vld [vmem:[%s575_s16] ss:$0 sm:$0xff]  ;;  %s1823_s16 = smov [#allocation23] }
 0x179   : >>> { %v585_v48 = vsel %vm584_vm12, %v576_v47, 0.0  ;;  %v616_v56 = vld [vmem:[%s1823_s16] sm:$0x3] }
 0x17a   : >>> { %586 = vadd.xlane.f32.xlu0 %v585_v48  ;;  %v591_v49 = vld [vmem:[%s590_s30] ss:$0 sm:$0xff]  ;;  %s1825_s30 = smov [#allocation12] }
 0x17b   : >>> { %v600_v50 = vsel %vm599_vm13, %v591_v49, 0.0  ;;  %v837_v57 = vld [vmem:[%s1825_s30] sm:$0x3] }
 0x17e   : >>> { %601 = vadd.xlane.f32.xlu0 %v600_v50 }
 0x207   : >>> { %v587_v51 = vpop.xlane.xlu0 %586 }
 0x208   : >>> { %589 = vst [vmem:[%s588_s21] sm:$0xff] %v587_v51  ;;  %s1829_s21 = smov [#allocation16] }
 0x209   : >>> { %v839_v59 = vld [vmem:[%s1829_s21] sm:$0x3] }
 0x20b   : >>> { %v602_v52 = vpop.xlane.xlu0 %601 }
 0x20c   : >>> { %604 = vst [vmem:[%s603_s14] sm:$0xff] %v602_v52  ;;  %s1853_s14 = smov [#allocation23] }
 0x20f   : >>> { %v606_v60 = vld [vmem:[%s605_s22] sm:$0xff]  ;;  %s1851_s22 = smov [#allocation22] }
 0x210   : >>> { %v830_v62 = vld [vmem:[%s829_s11] sm:$0xff]  ;;  %v617_v63 = vmul.f32 %v613_v53, %v606_v60  ;;  %v620_v0 = vmul.f32 %v614_v54, %v606_v60  ;;  %v624_v1 = vmul.f32 %v615_v55, %v606_v60  ;;  %v627_v2 = vmul.f32 %v616_v56, %v606_v60  ;;  %s1849_s11 = smov [#allocation12] }
 0x211   : >>> { %v841_v3 = vmul.f32 %v837_v57, %v830_v62  ;;  %v844_v4 = vmul.f32 %v838_v58, %v830_v62  ;;  %v848_v5 = vmul.f32 %v839_v59, %v830_v62  ;;  %v851_v8 = vmul.f32 %v840_v61, %v830_v62 }
 0x213   : >>> { %v608_v9 = vld [vmem:[%s607_s26] sm:$0xff]  ;;  %s635_s26 = smov [#allocation30] }
 0x214   : >>> { %v832_v10 = vld [vmem:[%s831_s25] sm:$0xff]  ;;  %v618_v11 = vmul.f32 %v615_v55, %v608_v9  ;;  %v621_v12 = vmul.f32 %v616_v56, %v608_v9  ;;  %v623_v13 = vmul.f32 %v613_v53, %v608_v9  ;;  %v626_v14 = vmul.f32 %v614_v54, %v608_v9  ;;  %s633_s25 = smov [#allocation29] }
 0x215   : >>> { %v842_v15 = vmul.f32 %v839_v59, %v832_v10  ;;  %v845_v16 = vmul.f32 %v840_v61, %v832_v10  ;;  %v847_v17 = vmul.f32 %v837_v57, %v832_v10  ;;  %v850_v18 = vmul.f32 %v838_v58, %v832_v10  ;;  %v634_v27 = vld [vmem:[%s633_s25] ss:$0 sm:$0xff]  ;;  %s662_s25 = smov [#allocation27] }
 0x216   : >>> { %v619_v19 = vsub.f32 %v617_v63, %v618_v11  ;;  %v622_v20 = vsub.f32 %v620_v0, %v621_v12  ;;  %v625_v21 = vadd.f32 %v624_v1, %v623_v13  ;;  %v628_v22 = vadd.f32 %v627_v2, %v626_v14  ;;  %v636_v28 = vld [vmem:[%s635_s26] ss:$0 sm:$0xff]  ;;  %s661_s26 = smov [#allocation20] }
 0x217   : >>> { %v843_v23 = vsub.f32 %v841_v3, %v842_v15  ;;  %v846_v24 = vsub.f32 %v844_v4, %v845_v16  ;;  %v849_v25 = vadd.f32 %v848_v5, %v847_v17  ;;  %v852_v26 = vadd.f32 %v851_v8, %v850_v18  ;;  %v669_v63 = vld [vmem:[%s662_s25] ss:$0 sm:$0xff]  ;;  %s905_s25 = sadd.s32 (%p462_p9), 1, %s1645_s17  }
 0x218   : >>> { %630 = vst [vmem:[%s1819_s15] sm:$0x3] %v622_v20  ;;  %632 = vst [vmem:[%s1823_s16] sm:$0x3] %v628_v22  ;;  %s1855_s15 = smov [#allocation20]  ;;  %s703_s16 = smov [#allocation28] }
 0x219   : >>> { %629 = vst [vmem:[%s1817_s29] sm:$0x3] %v619_v19  ;;  %631 = vst [vmem:[%s1821_s24] sm:$0x3] %v625_v21  ;;  %s1857_s24 = smov [#allocation16]  ;;  %s1865_s29 = smov [#allocation21]  ;;  %v710_v59 = vld [vmem:[%s703_s16] ss:$0 sm:$0xff] }
 0x21a   : >>> { %853 = vst [vmem:[%s1825_s30] sm:$0x3] %v843_v23  ;;  %854 = vst [vmem:[%s1827_s23] sm:$0x3] %v846_v24  ;;  %s1859_s23 = smov [#allocation14]  ;;  %s689_s30 = smov [#allocation22] }
 0x21b   : >>> { %855 = vst [vmem:[%s1829_s21] sm:$0x3] %v849_v25  ;;  %856 = vst [vmem:[%s1833_s27] sm:$0x3] %v852_v26  ;;  %s1863_s27 = smov [#allocation18]  ;;  %s702_s21 = smov [#allocation23] }
 0x21c   : >>> { %s805_s16 = smov [#allocation21]  ;;  %p458_p10 = scmp.ge.s32.totalorder (%p462_p9), %s905_s25, 15 }
 0x21d   : >> { %s2042_s17 = smov (%p462_p9), %s905_s25 }
 0x21f   : >>> { %v644_v30 = vld [vmem:[%s1853_s14] sm:$0x3] }
 0x220   : >>> { %v643_v29 = vld [vmem:[%s1851_s22] sm:$0x3]  ;;  %v652_v36 = vmul.f32 %v644_v30, %v636_v28  ;;  %v655_v42 = vmul.f32 %v644_v30, %v634_v27 }
 0x221   : >>> { %v641_v31 = vld [vmem:[%s1855_s15] sm:$0x3]  ;;  %v651_v35 = vmul.f32 %v643_v29, %v634_v27  ;;  %v654_v37 = vmul.f32 %v643_v29, %v636_v28 }
 0x222   : >>> { %v859_v32 = vld [vmem:[%s1849_s11] ss:$0 sm:$0xff]  ;;  %v1531_v34 = vld [vmem:[%s1849_s11 + $0x1] ss:$0 sm:$0xff]  ;;  %v645_v48 = vmul.f32 %v641_v31, %v634_v27  ;;  %v648_v49 = vmul.f32 %v641_v31, %v636_v28 }
 0x223   : >>> { %v1530_v33 = vld [vmem:[%s1849_s11 - $0x1] sm:$0x2]  ;;  %v1533_v40 = vld [vmem:[%s1857_s24 + $0x1] sm:$0x1]  ;;  %v653_v47 = vsub.f32 %v651_v35, %v652_v36  ;;  %v656_v53 = vadd.f32 %v655_v42, %v654_v37 }
 0x224   : >>> { %v866_v38 = vsel %vm789_vm14, %v859_v32, %v1530_v33  ;;  %v870_v39 = vld [vmem:[%s1857_s24] ss:$0 sm:$0xff]  ;;  %v878_v43 = vsel %vm801_vm15, %v1531_v34, %v1533_v40  ;;  %v1535_v45 = vld [vmem:[%s1859_s23 + $0x1] ss:$0 sm:$0xff] }
 0x225   : >>> { %v883_v41 = vld [vmem:[%s1859_s23] ss:$0 sm:$0xff]  ;;  %869 = vst [vmem:[%s1849_s11] sm:$0x3] %v866_v38  ;;  %880 = vst [vmem:[%s1857_s24] sm:$0x3] %v878_v43  ;;  %v1537_v51 = vld [vmem:[%s1863_s27 + $0x1] sm:$0x1] }
 0x226   : >>> { %v1534_v44 = vld [vmem:[%s1859_s23 - $0x1] sm:$0x2]  ;;  %1532 = vst [vmem:[%s1849_s11 + $0x1] sm:$0x1] %v870_v39  ;;  %v902_v54 = vsel %vm801_vm15, %v1535_v45, %v1537_v51  ;;  %659 = vst [vmem:[%s1851_s22] sm:$0x3] %v653_v47  ;;  %s676_s11 = smov [#allocation21] }
 0x227   : >>> { %v894_v46 = vld [vmem:[%s1863_s27] ss:$0 sm:$0xff]  ;;  %v890_v50 = vsel %vm789_vm14, %v883_v41, %v1534_v44  ;;  %660 = vst [vmem:[%s1853_s14] sm:$0x3] %v656_v53  ;;  %s1907_s22 = smov [#allocation22]  ;;  %s1652_s14 = smov 1  }
 0x228   : >>> { %v642_v52 = vld [vmem:[%s1865_s29] sm:$0x3]  ;;  %893 = vst [vmem:[%s1859_s23] sm:$0x3] %v890_v50  ;;  %904 = vst [vmem:[%s1863_s27] sm:$0x3] %v902_v54  ;;  %s718_s24 = smov [#allocation21]  ;;  %s1910_s27 = smov [#allocation23] }
 0x229   : >>> { %v646_v55 = vmul.f32 %v642_v52, %v636_v28  ;;  %v649_v56 = vmul.f32 %v642_v52, %v634_v27  ;;  %1536 = vst [vmem:[%s1859_s23 + $0x1] sm:$0x1] %v894_v46  ;;  %s1653_s23 = smov 127  }
 0x22b   : >>> { %v647_v57 = vsub.f32 %v645_v48, %v646_v55  ;;  %v650_v58 = vadd.f32 %v649_v56, %v648_v49 }
 0x22d   : >>> { %657 = vst [vmem:[%s1855_s15] sm:$0x3] %v647_v57  ;;  %658 = vst [vmem:[%s1865_s29] sm:$0x3] %v650_v58  ;;  %v696_v60 = vld [vmem:[%s689_s30] sm:$0x3]  ;;  %s717_s15 = smov [#allocation20]  ;;  %s781_s29 = smov [#allocation20] }
 0x22e   : >>> { %v700_v61 = vsel %vm699_vm0, 0.0, %v696_v60  ;;  %v711_v62 = vld [vmem:[%s702_s21] sm:$0x3] }
 0x22f   : >>> { %701 = vst [vmem:[%s689_s30] sm:$0x3] %v700_v61  ;;  %v715_v0 = vsel %vm714_vm1, %v710_v59, %v711_v62  ;;  %s782_s30 = smov [#allocation22] }
 0x230   : >>> { %716 = vst [vmem:[%s702_s21] sm:$0x3] %v715_v0  ;;  %s806_s21 = smov [#allocation23] }
 0x234   : >>> { %v670_v1 = vld [vmem:[%s661_s26] sm:$0x3] }
 0x235   : >>> { %v683_v2 = vld [vmem:[%s676_s11] sm:$0x3]  ;;  %v674_v3 = vsel %vm673_vm3, %v669_v63, %v670_v1 }
 0x236   : >>> { %v687_v4 = vsel %vm686_vm4, 0.0, %v683_v2  ;;  %675 = vst [vmem:[%s661_s26] sm:$0x3] %v674_v3  ;;  %v755_v5 = vld [vmem:[%s1907_s22] sm:$0x3]  ;;  %s370_s26 = smov (%p462_p9), [#allocation20] }
 0x237   : >>> { %688 = vst [vmem:[%s676_s11] sm:$0x3] %v687_v4  ;;  %756 = vrot.lane.b32.xlu0 %v755_v5, %s1652_s14  ;;  %v751_v11 = vld [vmem:[%s1910_s27] sm:$0x3]  ;;  %s389_s11 = smov (%p462_p9), [#allocation21] }
 0x238   : >>> { %v772_v12 = vld [vmem:[%s1910_s27] sm:$0x3] }
 0x239   : >>> { %v754_v30 = vld [vmem:[%s1907_s22] sm:$0x3] }
 0x23d   : >>> { %v723_v8 = vld [vmem:[%s717_s15] sm:$0x3] }
 0x23e   : >>> { %724 = vrot.lane.b32.xlu1 %v723_v8, %s1652_s14  ;;  %v719_v9 = vld [vmem:[%s718_s24] sm:$0x3] }
 0x23f   : >>> { %v740_v10 = vld [vmem:[%s718_s24] sm:$0x3] }
 0x240   : >>> { %v722_v18 = vld [vmem:[%s717_s15] sm:$0x3] }
 0x242   : >>> { %720 = vrot.lane.b32.xlu1 %v719_v9, %s1652_s14 }
 0x246   : >>> { %741 = vrot.lane.b32.xlu1 %v740_v10, %s1653_s23 }
 0x24a   : >>> { %752 = vrot.lane.b32.xlu1 %v751_v11, %s1652_s14  ;;  %s423_s14 = smov (%p462_p9), [#allocation23] }
 0x24e   : >>> { %773 = vrot.lane.b32.xlu1 %v772_v12, %s1653_s23 }
 0x2a9   : >>> { %v757_v20 = vpop.permute.xlu0 %756 }
 0x2aa   : >>> { %v761_v22 = vsel %vm728_vm5, %v755_v5, %v757_v20 }
 0x2b0   : >>> { %v725_v13 = vpop.permute.xlu1 %724 }
 0x2b1   : >>> { %v729_v14 = vsel %vm728_vm5, %v723_v8, %v725_v13 }
 0x2b4   : >>> { %v721_v15 = vpop.permute.xlu1 %720 }
 0x2b5   : >>> { %v733_v16 = vsel %vm732_vm6, %v721_v15, %v729_v14 }
 0x2b6   : >>> { %v739_v17 = vsel %vm1391_vm2, %v733_v16, 0.0 }
 0x2b7   : >>> { %747 = vst [vmem:[%s717_s15] sm:$0x3] %v739_v17 }
 0x2b8   : >>> { %v742_v19 = vpop.permute.xlu1 %741 }
 0x2b9   : >>> { %v746_v21 = vsel %vm732_vm6, %v722_v18, %v742_v19 }
 0x2ba   : >>> { %748 = vst [vmem:[%s718_s24] sm:$0x3] %v746_v21 }
 0x2bc   : >>> { %v753_v23 = vpop.permute.xlu1 %752 }
 0x2bd   : >>> { %v765_v24 = vsel %vm732_vm6, %v753_v23, %v761_v22 }
 0x2be   : >>> { %v783_v25 = vld [vmem:[%s781_s29] ss:$0 sm:$0xff]  ;;  %v1523_v27 = vld [vmem:[%s781_s29 + $0x1] ss:$0 sm:$0xff]  ;;  %v771_v29 = vsel %vm1391_vm2, %v765_v24, 0.0 }
 0x2bf   : >>> { %v1522_v26 = vld [vmem:[%s781_s29 - $0x1] sm:$0x2]  ;;  %779 = vst [vmem:[%s1907_s22] sm:$0x3] %v771_v29  ;;  %s406_s22 = smov (%p462_p9), [#allocation22] }
 0x2c0   : >>> { %v790_v28 = vsel %vm789_vm14, %v783_v25, %v1522_v26  ;;  %v774_v31 = vpop.permute.xlu1 %773 }
 0x2c1   : >>> { %793 = vst [vmem:[%s781_s29] sm:$0x3] %v790_v28  ;;  %v807_v32 = vld [vmem:[%s805_s16] ss:$0 sm:$0xff]  ;;  %v1527_v34 = vld [vmem:[%s805_s16 + $0x1] ss:$0 sm:$0xff]  ;;  %v778_v35 = vsel %vm732_vm6, %v754_v30, %v774_v31 }
 0x2c2   : >>> { %v1526_v33 = vld [vmem:[%s805_s16 - $0x1] sm:$0x2]  ;;  %780 = vst [vmem:[%s1910_s27] sm:$0x3] %v778_v35 }
 0x2c3   : >>> { %v814_v36 = vsel %vm789_vm14, %v807_v32, %v1526_v33 }
 0x2c4   : >>> { %817 = vst [vmem:[%s805_s16] sm:$0x3] %v814_v36 }
 0x2c6   : >>> { %v794_v37 = vld [vmem:[%s782_s30] ss:$0 sm:$0xff]  ;;  %v1525_v38 = vld [vmem:[%s782_s30 + $0x1] sm:$0x1] }
 0x2c7   : >>> { %1524 = vst [vmem:[%s781_s29 + $0x1] sm:$0x1] %v794_v37  ;;  %v802_v39 = vsel %vm801_vm15, %v1523_v27, %v1525_v38  ;;  %464 = sbr.rel (!%p462_p9) target bundleno = 279 (0x117), region = 462 }
 0x2c8   : >>> { %804 = vst [vmem:[%s782_s30] sm:$0x3] %v802_v39 }
 0x2c9   : >>> { %v818_v40 = vld [vmem:[%s806_s21] ss:$0 sm:$0xff]  ;;  %v1529_v41 = vld [vmem:[%s806_s21 + $0x1] sm:$0x1] }
 0x2ca   : >>> { %1528 = vst [vmem:[%s805_s16 + $0x1] sm:$0x1] %v818_v40  ;;  %v826_v42 = vsel %vm801_vm15, %v1527_v34, %v1529_v41 }
 0x2cb   : >>> { %828 = vst [vmem:[%s806_s21] sm:$0x3] %v826_v42 }
 0x2ce   : >> { %v376_v43 = vld [vmem:[%s370_s26] sm:$0x3] }
 0x2cf   : >> { %v377_v45 = vsel %vm1391_vm2, %v376_v43, 0.0  ;;  %v412_v47 = vld [vmem:[%s406_s22] sm:$0x3] }
 0x2d0   : >> { %v378_v49 = vmul.f32 %v377_v45, %v377_v45  ;;  %v413_v51 = vsel %vm1391_vm2, %v412_v47, 0.0 }
 0x2d1   : >> { %v395_v44 = vld [vmem:[%s389_s11] sm:$0x3]  ;;  %v414_v53 = vmul.f32 %v413_v51, %v413_v51 }
 0x2d2   : >> { %v396_v46 = vsel %vm1391_vm2, %v395_v44, 0.0  ;;  %v429_v48 = vld [vmem:[%s423_s14] sm:$0x3]  ;;  %v382_v56 = vsel %vm381_vm7, 0.0, %v378_v49 }
 0x2d3   : >> { %v397_v50 = vmul.f32 %v396_v46, %v396_v46  ;;  %v430_v52 = vsel %vm1391_vm2, %v429_v48, 0.0 }
 0x2d4   : >> { %v431_v55 = vmul.f32 %v430_v52, %v430_v52 }
 0x2d5   : >> { %v399_v54 = vadd.f32 %v397_v50, %v378_v49  ;;  %v398_v57 = vadd.f32 %v397_v50, %v382_v56 }
 0x2d6   : >> { %v435_v60 = vsel %vm434_vm8, 0.0, %v431_v55 }
 0x2d7   : >> { %v416_v58 = vadd.f32 %v414_v53, %v399_v54  ;;  %v415_v59 = vadd.f32 %v414_v53, %v398_v57 }
 0x2d9   : >> { %v437_v61 = vadd.f32 %v431_v55, %v416_v58  ;;  %v436_v62 = vadd.f32 %v435_v60, %v415_v59 }
 0x2db   : >> { %438 = vadd.xlane.f32.xlu0 %v437_v61 }
 0x2df   : >> { %446 = vadd.xlane.f32.xlu0 %v436_v62 }
 0x368   : >> { %v439_v63 = vpop.xlane.xlu0 %438 }
 0x369   : >> { %v440_v0 = vrot.slane %v439_v63, 4 }
 0x36b   : >> { %v441_v1 = vadd.f32 %v440_v0, %v439_v63 }
 0x36c   : >> { %v447_v2 = vpop.xlane.xlu0 %446 }
 0x36d   : >> { %v442_v3 = vrot.slane %v441_v1, 2  ;;  %v448_v4 = vrot.slane %v447_v2, 4 }
 0x36f   : >> { %v449_v5 = vadd.f32 %v448_v4, %v447_v2  ;;  %v443_v8 = vadd.f32 %v442_v3, %v441_v1 }
 0x371   : >> { %v450_v9 = vrot.slane %v449_v5, 2  ;;  %v444_v11 = vrot.slane %v443_v8, 1 }
 0x373   : >> { %v451_v10 = vadd.f32 %v450_v9, %v449_v5  ;;  %v445_v14 = vadd.f32 %v444_v11, %v443_v8 }
 0x375   : >> { %v452_v12 = vrot.slane %v451_v10, 1 }
 0x377   : >> { %v453_v13 = vadd.f32 %v452_v12, %v451_v10 }
 0x379   : >> { %1556 = vpush %v453_v13 }
 0x37a   : >> { %1558 = vpush %v445_v14 }
 0x3aa   : >> { %s1557_s20 = spop %1556 }
 0x3ab   : >> { %s1559_s15 = spop %1558 }
 0x3ac   : >> { %s456_s24 = smul.f32 1e-10, %s1559_s15 }
 0x3ae   : >> { %p457_p11 = scmp.le.f32.partialorder %s1557_s20, %s456_s24 }
 0x3b0   : >> { %p459_p12 = por %p458_p10, %p457_p11 }
 0x3b2   : > { %907 = sbr.rel (!%p459_p12) target bundleno = 278 (0x116), region = 473 }
 0x3b9 PF: > { %s912_s23 = smov [#allocation20]  ;;  %v916_v6 = vmov %v1761_v6  ;;  %v919_v7 = vmov %v1763_v7  ;;  %v967_v15 = vld [vmem:[#allocation12] sm:$0x3]  ;;  %v973_v16 = vld [vmem:[#allocation14] sm:$0x3]  ;;  %s2043_s17 = scalar_lea.vmem [#allocation13], %s1757_s28 }
 0x3ba   : > { %v936_v6 = vmov %v1761_v6  ;;  %v939_v7 = vmov %v1763_v7  ;;  %v920_v17 = vld [vmem:[%s912_s23] sm:$0x3]  ;;  %vm923_vm9 = vcmp.eq.s32.totalorder %v919_v7, %v916_v6  ;;  %969 = vst [vmem:[%s2043_s17] sm:$0x3] %v967_v15  ;;  %s2044_s27 = scalar_lea.vmem [#allocation15], %s1757_s28  ;;  %s932_s29 = smov [#allocation23] }
 0x3bb   : > { %vm943_vm10 = vcmp.eq.s32.totalorder %v939_v7, %v936_v6  ;;  %975 = vst [vmem:[%s2044_s27] sm:$0x3] %v973_v16  ;;  %v979_v18 = vld [vmem:[#allocation16] sm:$0x3]  ;;  %v924_v19 = vsel %vm923_vm9, %v920_v17, 0.0  ;;  %s2045_s16 = scalar_lea.vmem [#allocation17], %s1757_s28  ;;  %s2046_s30 = scalar_lea.vmem [#allocation19], %s1757_s28 }
 0x3bc   : > { %981 = vst [vmem:[%s2045_s16] sm:$0x3] %v979_v18  ;;  %v985_v20 = vld [vmem:[#allocation18] sm:$0x3]  ;;  %v925_v21 = vrot.slane %v924_v19, 4  ;;  %v940_v22 = vld [vmem:[%s932_s29] sm:$0x3] }
 0x3bd   : > { %987 = vst [vmem:[%s2046_s30] sm:$0x3] %v985_v20  ;;  %v944_v23 = vsel %vm943_vm10, %v940_v22, 0.0  ;;  %s908_s21 = sand.u32 7, %s1720_s12   ;;  %s2047_s11 = scalar_lea.vmem [#allocation9], %s1759_s18 }
 0x3be   : > { %v926_v24 = vadd.f32 %v925_v21, %v924_v19  ;;  %v945_v25 = vrot.slane %v944_v23, 4  ;;  %s909_s25 = scalar_lea.vmem [#allocation8], %s908_s21  ;;  %s911_s26 = scalar_lea.vmem [#allocation10], %s908_s21 }
 0x3bf   : > { %s913_s25 = smov %s909_s25  ;;  %s933_s26 = smov %s911_s26 }
 0x3c0   : > { %v927_v26 = vrot.slane %v926_v24, 2  ;;  %v946_v6 = vadd.f32 %v945_v25, %v944_v23  ;;  %s2048_s22 = scalar_lea.vmem [#allocation11], %s1759_s18  ;;  %s1015_s14 = sshrl.u32 (%p1734_p3), %s1720_s12, 3 }
 0x3c1   : > { %s2049_s20 = scalar_lea.vmem (%p1734_p3), [#allocation9], %s1759_s18  ;;  %s1544_s15 = sshll.u32 (%p1734_p3), %s1015_s14, 1 }
 0x3c2   : > { %v928_v7 = vadd.f32 %v927_v26, %v926_v24  ;;  %v947_v27 = vrot.slane %v946_v6, 2  ;;  %s1017_s17 = scalar_lea.vmem (%p1734_p3), %s2034_s4, %s1544_s15 }
 0x3c4   : > { %v929_v28 = vrot.slane %v928_v7, 1  ;;  %v948_v29 = vadd.f32 %v947_v27, %v946_v6 }
 0x3c6   : > { %v930_v30 = vadd.f32 %v929_v28, %v928_v7  ;;  %v949_v31 = vrot.slane %v948_v29, 1 }
 0x3c8   : > { %931 = vst [vmem:[%s913_s25] sm:$0x1] %v930_v30  ;;  %v950_v32 = vadd.f32 %v949_v31, %v948_v29 }
 0x3ca   : > { %951 = vst [vmem:[%s933_s26] sm:$0x1] %v950_v32 }
 0x3cc   : > { %1014 = sbr.rel (!%p1734_p3) target bundleno = 985 (0x3d9), region = 158 }
 0x3cf   : > { %v955_v33 = vld [vmem:[#allocation8] sm:$0x3] }
 0x3d0   : > { %957 = vst [vmem:[%s2047_s11] sm:$0x3] %v955_v33 }
 0x3d1   : > { %v961_v34 = vld [vmem:[#allocation10] sm:$0x3] }
 0x3d2   : > { %963 = vst [vmem:[%s2048_s22] sm:$0x3] %v961_v34 }
 0x3d7   : > { %v1033_v35 = vld [vmem:[%s2049_s20] sm:$0x3] }
 0x3d8   : > { %1034 = vst [vmem:[%s1017_s17] sm:$0x3] %v1033_v35 }
 0x3d9 PF: > { %1051 = sbr.rel (!%p1734_p3) target bundleno = 993 (0x3e1), region = 192  ;;  %s1052_s27 = sshrl.u32 (%p1734_p3), %s1720_s12, 3 }
 0x3da   : > { %s2050_s29 = scalar_lea.vmem (%p1734_p3), [#allocation11], %s1759_s18  ;;  %s1545_s16 = sshll.u32 (%p1734_p3), %s1052_s27, 1 }
 0x3db   : > { %s1054_s25 = scalar_lea.vmem (%p1734_p3), %s2035_s5, %s1545_s16 }
 0x3df   : > { %v1070_v36 = vld [vmem:[%s2050_s29] sm:$0x3] (%p1734_p3) }
 0x3e0   : > { %1071 = vst [vmem:[%s1054_s25] sm:$0x3] %v1070_v36 }
 0x3e1 PF: > { %s1546_s26 = sshll.u32 %s1720_s12, 1  ;;  %s2051_s19 = scalar_lea.vmem [#allocation13], %s1757_s28 }
 0x3e2   : > { %v1103_v37 = vld [vmem:[%s2051_s19] sm:$0x3]  ;;  %s2052_s11 = scalar_lea.vmem [#allocation15], %s1757_s28  ;;  %s1087_s14 = scalar_lea.vmem %s2036_s6, %s1546_s26 }
 0x3e3   : > { %v1136_v38 = vld [vmem:[%s2052_s11] sm:$0x3]  ;;  %s1120_s24 = scalar_lea.vmem %s2037_s7, %s1546_s26  ;;  %s2053_s23 = scalar_lea.vmem [#allocation17], %s1757_s28  ;;  %1104 = vst [vmem:[%s1087_s14] sm:$0x3] %v1103_v37 }
 0x3e4   : > { %v1169_v39 = vld [vmem:[%s2053_s23] sm:$0x3]  ;;  %s2054_s17 = scalar_lea.vmem [#allocation19], %s1757_s28  ;;  %1137 = vst [vmem:[%s1120_s24] sm:$0x3] %v1136_v38  ;;  %s1153_s29 = scalar_lea.vmem %s2038_s8, %s1546_s26 }
 0x3e5   : > { %v1202_v40 = vld [vmem:[%s2054_s17] sm:$0x3]  ;;  %s1186_s21 = scalar_lea.vmem %s2039_s9, %s1546_s26  ;;  %1170 = vst [vmem:[%s1153_s29] sm:$0x3] %v1169_v39 }
 0x3e6   : > { %1203 = vst [vmem:[%s1186_s21] sm:$0x3] %v1202_v40 }
 0x3e7 PF: > { %s2055_s25 = sld [smem:[#allocation33_spill]]  ;;  %p13_p13 = scmp.ge.s32.totalorder %s1723_s13, 4  }
 0x3e8   : > { %s2056_s30 = smov %s1637_s10  ;;  %s2058_s11 = smov %s1723_s13 }
 0x3e9   :  { %15 = sbr.rel (!%p13_p13) target bundleno = 2 (0x2), region = 484 }
 0x3ed   : > { %s2057_s10 = smov %s2055_s25 }

// kernel: reverse
= control target key start
LH: loop header
LB: loop body
LE: loop exit
PB: predicated region body
PF: predicated region fallthrough
CT: control target
= control target key end

     0   :  { %v2_v0 = vlaneseq  ;;  %s105_s0 = inlined_call_operand.vmem [shape: f32[2,3], index: 0, kind: input, shape index: {}]   ;;  %s106_s1 = inlined_call_operand.vmem [shape: f32[2,3], index: 1, kind: output, shape index: {}]  }
   0x2   :  { %v3_v1 = vsub.s32 2, %v2_v0 }
   0x4   :  { %4 = vset.pattern.permute.xlu0 %v3_v1 }
   0x5   :  { %v20_v2 = vld [vmem:[%s105_s0] sm:$0x3] }
   0x6   :  { %21 = vst [vmem:[#allocation1] sm:$0x3] %v20_v2 }
   0xd   :  { %v38_v3 = vld [vmem:[#allocation1] sm:$0x3] }
   0xe   :  { %39 = vst [vmem:[#allocation0] sm:$0x3] %v38_v3 }
  0x15   :  { %v40_v4 = vld [vmem:[#allocation0] sm:$0xff] }
  0x16   :  { %41 = vperm.xlu0 %4, %v40_v4  }
  0x95   :  { %v42_v5 = vpop.permute.xlu0 %41 }
  0x96   :  { %43 = vst [vmem:[#allocation2] sm:$0xff] %v42_v5 }
  0x9d   :  { %v47_v6 = vld [vmem:[#allocation2] sm:$0x3] }
  0x9e   :  { %49 = vst [vmem:[#allocation3] sm:$0x3] %v47_v6 }
  0xa5   :  { %v65_v7 = vld [vmem:[#allocation3] sm:$0x3] }
  0xa6   :  { %66 = vst [vmem:[%s106_s1] sm:$0x3] %v65_v7 }

// kernel: custom-call.16
= control target key start
LH: loop header
LB: loop body
LE: loop exit
PB: predicated region body
PF: predicated region fallthrough
CT: control target
= control target key end

     0   :  { %s653_s9 = smov 0   ;;  %s655_s10 = smov 0   ;;  %s799_s0 = inlined_call_operand.vmem [shape: f32[2,3,3], index: 0, kind: input, shape index: {}]   ;;  %s800_s1 = inlined_call_operand.vmem [shape: f32[2,3,3], index: 1, kind: output, shape index: {0}]   ;;  %s801_s2 = inlined_call_operand.vmem [shape: f32[2,3], index: 2, kind: output, shape index: {1}]  }
   0x1   :  { %s657_s11 = smov 0   ;;  %s659_s12 = smov 0  }
   0x2   :  { %s661_s13 = smov 0  }
   0x3 LB: > { %s28_s14 = sadd.s32 1, %s626_s12  ;;  %s508_s15 = sadd.s32 4294967295, %s630_s13   ;;  %s630_s13 = sphi %s661_s13, %s9_s13   ;;  %s626_s12 = sphi %s659_s12, %s808_s12   ;;  %s622_s11 = sphi %s657_s11, %s807_s11   ;;  %s618_s10 = sphi %s655_s10, %s806_s10   ;;  %s614_s9 = sphi %s653_s9, %s805_s9  }
   0x4   : > { %p30_p0 = scmp.ge.s32.totalorder %s28_s14, 2  ;;  %s33_s16 = ssub.s32 0, %s626_s12 }
   0x5   : > { %s510_s17 = smin.u32 %s626_s12, %s33_s16  ;;  %p57_p1 = scmp.ne.s32.totalorder %s618_s10, %s614_s9 }
   0x6   : > { %s810_s14 = smov (%p30_p0, %s28_s14), 0  ;;  %s35_s18 = sshrl.u32 %s510_s17, 3 }
   0x7   : > { %s39_s19 = ssub.s32 0, %s810_s14  ;;  %p58_p2 = scmp.eq.s32.totalorder %s508_s15, 1 }
   0x8   : > { %s511_s20 = smin.u32 %s39_s19, %s810_s14  ;;  %s47_s24 = sadd.s32 1, %s618_s10 }
   0x9   : > { %s41_s21 = sshrl.u32 %s511_s20, 3  ;;  %p688_p3 = por %p58_p2, %p57_p1 }
   0xa   : > { %s44_s23 = ssub.s32 %s35_s18, %s41_s21  ;;  %p513_p5 = scmp.ge.s32.totalorder %s630_s13, 2 }
   0xb   : > { %p45_p4 = scmp.eq.s32.totalorder %s44_s23, 0  ;;  %s82_s26 = sand.u32 (!%p513_p5), 1, %s630_s13  }
   0xc   : > { %80 = sbr.rel (%p513_p5) target bundleno = 19 (0x13), region = 16  ;;  %s515_s27 = sshll.u32 (!%p513_p5), %s626_s12, 2 }
   0xd   : > { %s694_s25 = scalar_select %p45_p4, %s618_s10, %s47_s24  }
   0xe   : > { %s514_s28 = sshll.u32 (!%p513_p5), %s82_s26, 2  ;;  %s88_s3 = scalar_lea.vmem (!%p513_p5), %s799_s0, %s515_s27 }
   0xf   : > { %v104_v0 = vld [vmem:[%s88_s3] sm:$0xf] (!%p513_p5)  ;;  %s84_s4 = scalar_lea.vmem (!%p513_p5), [#allocation1], %s514_s28 }
  0x10   : > { %105 = vst [vmem:[%s84_s4] sm:$0xf] (!%p513_p5), %v104_v0 }
  0x13 PF: > { %p516_p6 = scmp.ge.s32.totalorder %s630_s13, 1  ;;  %p121_p7 = scmp.lt.s32.totalorder %s630_s13, 3 }
  0x15   : > { %p122_p8 = pnand %p516_p6, %p121_p7 }
  0x17   : > { %125 = sbr.rel (%p122_p8) target bundleno = 346 (0x15a), region = 50 }
  0x1e   : > { %s132_s5 = sand.u32 1, %s508_s15   ;;  %s142_s6 = sand.u32 1, %s614_s9   ;;  %v636_v2 = vmov 0.0  }
  0x1f   : > { %s517_s7 = sshll.u32 %s132_s5, 2  ;;  %s705_s8 = sshll.u32 %s142_s6, 1 }
  0x20   : > { %s134_s16 = scalar_lea.vmem [#allocation1], %s517_s7  ;;  %s155_s17 = sand.u32 7, %s622_s11  }
  0x21   : > { %v147_v1 = vld [vmem:[%s134_s16] sm:$0xf]  ;;  %s708_s18 = scalar_lea.vmem [#allocation4], %s155_s17  ;;  %s711_s19 = scalar_lea.vmem [#allocation3], %s517_s7 }
  0x22   : > { %148 = vst [vmem:[#allocation0] sm:$0xf] %v147_v1  ;;  %159 = vst [vmem:[%s708_s18] sm:$0x1] %v636_v2  ;;  %s144_s15 = scalar_lea.vmem [#allocation5], %s705_s8  ;;  %s714_s20 = smov 0  }
  0x29   : > { %v157_v3 = vld [vmem:[#allocation0] sm:$0xff] }
  0x2a   : > { %158 = vst [vmem:[#allocation2] sm:$0xff] %v157_v3 }
  0x2b LB: >> { %v167_v4 = vlaneseq  ;;  %v723_v6 = vstv %s634_s20  ;;  %s194_s9 = scalar_lea.vmem [#allocation2], %s634_s20  ;;  %s230_s21 = smov [#allocation2]  ;;  %v637_v60 = vmov 1.0   ;;  %v265_v61 = vld [vmem:[%s708_s18] ss:$0 sm:$0xff]  ;;  %s634_s20 = sphi %s714_s20, %s165_s20  }
  0x2c   : >> { %s252_s23 = scalar_lea.vmem [#allocation6], %s634_s20  ;;  %s268_s24 = smov [#allocation2] }
  0x2d   : >> { %v720_v5 = vshrl.u32 %v167_v4, 7  ;;  %v246_v49 = vand.u32 127, %v167_v4  ;;  %s269_s26 = smov [#allocation6] }
  0x2f   : >> { %vm171_vm0 = vcmp.gt.s32.totalorder %v720_v5, %v723_v6  ;;  %vm172_vm1 = vcmp.lt.s32.totalorder %v720_v5, 3  ;;  %v233_v5 = vmov %v720_v5  ;;  %vm738_vm12 = vcmp.eq.s32.totalorder %v246_v49, %v723_v6 }
  0x30   : >> { %vm173_vm2 = vmand %vm171_vm0, %vm172_vm1  ;;  %vm237_vm9 = vcmp.gt.s32.totalorder %v233_v5, %v723_v6  ;;  %vm238_vm10 = vcmp.lt.s32.totalorder %v233_v5, 3  ;;  %v272_v5 = vmov %v720_v5  ;;  %vm298_vm15 = vcmp.gt.s32.totalorder %v246_v49, %v723_v6 }
  0x31   : >> { %v166_v7 = vld [vmem:[#allocation2] sm:$0xff]  ;;  %v195_v16 = vld [vmem:[%s194_s9] ss:$0 sm:$0xff]  ;;  %vm239_vm11 = vmand %vm237_vm9, %vm238_vm10  ;;  %vm277_vm13 = vcmp.lt.s32.totalorder %v272_v5, 3  ;;  %v289_v5 = vmov %v720_v5 }
  0x32   : >> { %v174_v8 = vsel %vm173_vm2, %v166_v7, 0.0  ;;  %v196_v17 = vand.u32 2147483647, %v195_v16  ;;  %vm221_vm8 = vcmp.lt.f32.partialorder %v195_v16, 0.0  ;;  %v234_v46 = vld [vmem:[%s230_s21] sm:$0xff]  ;;  %vm306_vm14 = vcmp.ge.s32.totalorder %v289_v5, %v723_v6 }
  0x33   : >> { %v175_v9 = vmul.f32 %v174_v8, %v174_v8  ;;  %v240_v50 = vsel %vm239_vm11, %v234_v46, 0.0  ;;  %v275_v0 = vld [vmem:[%s268_s24] sm:$0xff]  ;;  %s285_s24 = smov %s268_s24  ;;  %vm307_vm0 = vmand %vm738_vm12, %vm306_vm14 }
  0x34   : >> { %v197_v22 = vmax.f32 %v196_v17, 0.0  ;;  %s310_s27 = scalar_lea.vmem %s285_s24, %s634_s20  ;;  %s165_s20 = sadd.s32 1, %s634_s20  }
  0x35   : >> { %v176_v10 = vrot.slane %v175_v9, 4  ;;  %p162_p9 = scmp.ge.s32.totalorder %s165_s20, 3  }
  0x36   : > { %s523_s28 = sshll.u32 (%p162_p9), %s622_s11, 2 }
  0x37   : >> { %v177_v11 = vadd.f32 %v176_v10, %v175_v9  ;;  %s341_s3 = scalar_lea.vmem (%p162_p9), %s800_s1, %s523_s28 }
  0x39   : >> { %v178_v12 = vrot.slane %v177_v11, 2 }
  0x3b   : >> { %v179_v13 = vadd.f32 %v178_v12, %v177_v11 }
  0x3d   : >> { %v180_v14 = vrot.slane %v179_v13, 1 }
  0x3f   : >> { %v181_v15 = vadd.f32 %v180_v14, %v179_v13  ;;  %v296_v14 = vld [vmem:[%s285_s24] sm:$0xff] }
  0x41   : >> { %578 = vrsqrt.f32 %v181_v15  ;;  %vm184_vm3 = vcmp.eq.f32.partialorder %v181_v15, inf  ;;  %v187_v19 = vand.u32 2147483648, %v181_v15  ;;  %vm186_vm4 = vcmp.eq.f32.partialorder %v181_v15, 0.0 }
  0x4b   : >> { %v579_v18 = vpop.eup %578 }
  0x4c   : >> { %v183_v20 = vmul.f32 %v579_v18, %v181_v15 }
  0x4e   : >> { %v185_v21 = vsel %vm184_vm3, %v181_v15, %v183_v20 }
  0x4f   : >> { %v188_v23 = vsel %vm186_vm4, %v187_v19, %v185_v21 }
  0x50   : >> { %v198_v24 = vand.u32 2147483647, %v188_v23 }
  0x52   : >> { %v199_v25 = vmax.f32 %v197_v22, %v198_v24 }
  0x54   : >> { %580 = vrcp.f32 %v199_v25  ;;  %vm211_vm7 = vcmp.eq.f32.partialorder %v199_v25, 0.0 }
  0x5e   : >> { %v581_v26 = vpop.eup %580 }
  0x5f   : >> { %v201_v27 = vmul.f32 %v581_v26, %v196_v17  ;;  %v204_v28 = vmul.f32 0.0, %v581_v26  ;;  %v208_v29 = vmul.f32 %v581_v26, %v198_v24 }
  0x61   : >> { %v202_v30 = vmul.f32 %v201_v27, %v201_v27  ;;  %v205_v31 = vmul.f32 %v204_v28, %v204_v28  ;;  %v209_v32 = vmul.f32 %v208_v29, %v208_v29 }
  0x63   : >> { %v206_v33 = vadd.f32 %v205_v31, %v202_v30 }
  0x65   : >> { %v210_v34 = vadd.f32 %v209_v32, %v206_v33 }
  0x67   : >> { %582 = vrsqrt.f32 %v210_v34  ;;  %vm214_vm5 = vcmp.eq.f32.partialorder %v210_v34, inf  ;;  %v217_v36 = vand.u32 2147483648, %v210_v34  ;;  %vm216_vm6 = vcmp.eq.f32.partialorder %v210_v34, 0.0 }
  0x71   : >> { %v583_v35 = vpop.eup %582 }
  0x72   : >> { %v213_v37 = vmul.f32 %v583_v35, %v210_v34 }
  0x74   : >> { %v215_v38 = vsel %vm214_vm5, %v210_v34, %v213_v37 }
  0x75   : >> { %v218_v39 = vsel %vm216_vm6, %v217_v36, %v215_v38 }
  0x76   : >> { %v219_v40 = vmul.f32 %v218_v39, %v199_v25 }
  0x78   : >> { %v220_v41 = vsel %vm211_vm7, 0.0, %v219_v40 }
  0x79   : >> { %v222_v42 = vxor.u32 2147483648, %v220_v41 }
  0x7b   : >> { %v223_v43 = vsel %vm221_vm8, %v220_v41, %v222_v42 }
  0x7c   : >> { %v731_v44 = vsel %vm186_vm4, %v195_v16, %v223_v43  ;;  %584 = vrcp.f32 %v223_v43  ;;  %v224_v47 = vsub.f32 %v223_v43, %v195_v16 }
  0x7d   : >> { %v229_v45 = vsub.f32 %v195_v16, %v731_v44 }
  0x7f   : >> { %586 = vrcp.f32 %v229_v45 }
  0x86   : >> { %v585_v48 = vpop.eup %584 }
  0x87   : >> { %v226_v51 = vmul.f32 %v585_v48, %v224_v47 }
  0x89   : >> { %v587_v52 = vpop.eup %586  ;;  %v228_v56 = vsel %vm186_vm4, 0.0, %v226_v51 }
  0x8a   : >> { %v242_v53 = vmul.f32 %v587_v52, %v240_v50  ;;  %v258_v58 = vsel %vm738_vm12, %v228_v56, 0.0 }
  0x8c   : >> { %v243_v55 = vsel %vm186_vm4, 0.0, %v242_v53 }
  0x8d   : >> { %v248_v57 = vsel %vm738_vm12, %v243_v55, 0.0 }
  0x8e   : >> { %249 = vadd.xlane.f32.xlu0 %v248_v57 }
  0x92   : >> { %259 = vadd.xlane.f32.xlu0 %v258_v58 }
 0x11b   : >> { %v250_v59 = vpop.xlane.xlu0 %249 }
 0x11c   : >> { %251 = vst [vmem:[#allocation6] sm:$0xff] %v250_v59 }
 0x11d   : >> { %253 = vst [vmem:[%s252_s23] sm:$0x1] %v637_v60 }
 0x11f   : >> { %v260_v62 = vpop.xlane.xlu0 %259 }
 0x120   : >> { %v266_v63 = vsel %vm738_vm12, %v260_v62, %v265_v61 }
 0x121   : >> { %267 = vst [vmem:[%s708_s18] sm:$0x1] %v266_v63 }
 0x124   : >> { %v274_v1 = vld [vmem:[%s269_s26] sm:$0xff]  ;;  %s286_s26 = smov %s269_s26 }
 0x125   : >> { %v276_v2 = vmul.f32 %v275_v0, %v274_v1  ;;  %v294_v13 = vld [vmem:[%s286_s26] sm:$0xff] }
 0x127   : >> { %v278_v3 = vsel %vm277_vm13, %v276_v2, 0.0 }
 0x128   : >> { %v279_v4 = vrot.slane %v278_v3, 4  ;;  %v327_v6 = vld [vmem:[#allocation4] sm:$0x3] (%p162_p9) }
 0x129   : > { %329 = vst [vmem:[%s144_s15] sm:$0x3] (%p162_p9), %v327_v6 }
 0x12a   : >> { %v280_v7 = vadd.f32 %v279_v4, %v278_v3 }
 0x12c   : >> { %v281_v8 = vrot.slane %v280_v7, 2 }
 0x12e   : >> { %v282_v9 = vadd.f32 %v281_v8, %v280_v7 }
 0x130   : >> { %v283_v10 = vrot.slane %v282_v9, 1 }
 0x132   : >> { %v284_v11 = vadd.f32 %v283_v10, %v282_v9 }
 0x134   : >> { %v290_v12 = vmul.f32 %v284_v11, %v260_v62 }
 0x136   : >> { %v295_v15 = vmul.f32 %v294_v13, %v290_v12 }
 0x138   : >> { %v299_v16 = vsub.f32 %v296_v14, %v295_v15 }
 0x13a   : >> { %v300_v17 = vsel %vm298_vm15, %v299_v16, %v296_v14 }
 0x13b   : >> { %v308_v18 = vsel %vm307_vm0, %v294_v13, %v300_v17 }
 0x13c   : >> { %309 = vst [vmem:[%s285_s24] sm:$0xff] %v308_v18 }
 0x13f   : > { %164 = sbr.rel (!%p162_p9) target bundleno = 43 (0x2b), region = 167 }
 0x143   : >> { %v311_v19 = vld [vmem:[%s310_s27] ss:$0 sm:$0xff] }
 0x144   : >> { %v316_v20 = vsel %vm738_vm12, %v731_v44, %v311_v19 }
 0x145   : >> { %317 = vst [vmem:[%s310_s27] sm:$0x1] %v316_v20 }
 0x146   : > { %p376_p10 = scmp.lt.s32.totalorder (%p688_p3), %s622_s11, 0  ;;  %s377_s4 = ssub.s32 (%p688_p3), 0, %s622_s11  ;;  %v399_v22 = vld [vmem:[%s144_s15] sm:$0x3] (%p688_p3) }
 0x147   : > { %s524_s5 = smin.u32 (%p688_p3), %s622_s11, %s377_s4 }
 0x148   : > { %s379_s6 = sshrl.u32 (%p688_p3), %s524_s5, 3 }
 0x149   : > { %s380_s7 = ssub.s32 (%p688_p3), 0, %s379_s6 }
 0x14c   : > { %v321_v5 = vld [vmem:[#allocation2] sm:$0xf] }
 0x14d   : > { %323 = vst [vmem:[%s711_s19] sm:$0xf] %v321_v5 }
 0x14f   : > { %375 = sbr.rel (!%p688_p3) target bundleno = 346 (0x15a), region = 91 }
 0x154   : > { %v357_v21 = vld [vmem:[%s711_s19] sm:$0xf] }
 0x155   : > { %358 = vst [vmem:[%s341_s3] sm:$0xf] %v357_v21 }
 0x156   : > { %s812_s7 = smov (!%p376_p10, %s380_s7), %s379_s6 }
 0x157   : > { %s525_s16 = sshll.u32 %s812_s7, 1 }
 0x158   : > { %s383_s19 = scalar_lea.vmem %s801_s2, %s525_s16 }
 0x159   : > { %400 = vst [vmem:[%s383_s19] sm:$0x3] %v399_v22 }
 0x15a PF: > { %s9_s13 = sadd.s32 1, %s630_s13   ;;  %s805_s9 = smov %s618_s10 }
 0x15b   : > { %p6_p11 = scmp.ge.s32.totalorder %s9_s13, 4   ;;  %s806_s10 = smov %s694_s25 }
 0x15c   : > { %s807_s11 = smov %s626_s12  ;;  %s808_s12 = smov %s810_s14 }
 0x15d   :  { %8 = sbr.rel (!%p6_p11) target bundleno = 3 (0x3), region = 178 }

</bundles_post_ra>
